<compile_context>
chip_gen: v5e
topology: v5e:2x2
jax: 0.10.0
libtpu: 0.0.40
codegen_flags: <defaults>
</compile_context>

<pallas_src>
import functools

import jax
import jax.numpy as jnp
from jax import lax
from jax.experimental import pallas as pl
from jax.experimental.pallas import tpu as pltpu


def _pick_batch_fold(batch, embd, max_lanes=256):
  """Smallest batch fold bt with bt*embd a multiple of 128 (lane-dense stores),
  falling back to the largest fold keeping bt*embd <= max_lanes."""
  best = 1
  for bt in range(1, max(batch, 1) + 1):
    lanes = bt * embd
    if lanes > max_lanes and best > 1:
      break
    if lanes % 128 == 0:
      return bt
    if lanes <= max_lanes:
      best = bt
  return best


def sensor_attention_kernel(
    x_ref,        # (1, T, L)   folded input block, L = bt*D (lanes = b*D + d)
    gamma_ref,    # (1, L)      LayerNorm gamma, tiled over the batch fold
    beta_ref,     # (1, L)      LayerNorm beta,  tiled over the batch fold
    seg_ref,      # (L, L)      block-diag ones -> per-D segment sums on MXU
    tsh_ref,      # (k, T, T)   zero-padded time-shift matrices
    wconv_ref,    # (k, L, F*L) banded dilated-conv weights (filter-major cols)
    w1x1_ref,     # (F*L, L)    1x1 conv (F -> 1) weights
    b1_ref,       # (1, F*L)    conv_1 bias broadcast to lanes
    bf_ref,       # (1,) SMEM   conv_f scalar bias
    out_ref,      # (1, T, L)
    attn_ref,     # (1, T, L)
    *, ksize, dilation, pad, embd, eps):
  x = x_ref[0].astype(jnp.float32)                                   # (T, L)

  # ---- LayerNorm over each D-lane segment (segment sums on the MXU) ----
  inv_d = 1.0 / float(embd)
  seg = seg_ref[...]
  mean = jnp.dot(x, seg, preferred_element_type=jnp.float32) * inv_d
  xc = x - mean
  var = jnp.dot(xc * xc, seg, preferred_element_type=jnp.float32) * inv_d
  x_ln = xc * lax.rsqrt(var + eps) * gamma_ref[...] + beta_ref[...]  # (T, L)

  # ---- dilated kxk conv (1 -> F) entirely on the MXU ----
  # Tap i: shift along T with zero fill via the (T,T) shift matrix, then one
  # banded matmul folds all k D-direction taps and all filters.  D-border and
  # batch-segment boundaries are zeros of the band; T borders are zeros of the
  # shift matrix -> no masks anywhere.
  conv = None
  for i in range(ksize):
    off = i * dilation - pad
    xs = x_ln if off == 0 else jnp.dot(
        tsh_ref[i], x_ln, preferred_element_type=jnp.float32)        # (T, L)
    part = jnp.dot(xs, wconv_ref[i],
                   preferred_element_type=jnp.float32)               # (T, F*L)
    conv = part if conv is None else conv + part

  r = jnp.maximum(conv + b1_ref[...], 0.0)                           # (T, F*L)

  # ---- 1x1 conv (F -> 1) on the MXU, plus scalar bias ----
  z = jnp.dot(r, w1x1_ref[...], preferred_element_type=jnp.float32) + bf_ref[0]

  # ---- softmax over the time axis (sublanes) ----
  m = jnp.max(z, axis=0, keepdims=True)
  e = jnp.exp(z - m)
  denom = jnp.sum(e, axis=0, keepdims=True)                          # (1, L)
  attn = e * (1.0 / denom)            # exact reciprocal on one tiny row

  attn_ref[0] = attn.astype(attn_ref.dtype)
  out_ref[0] = (x_ln * attn).astype(out_ref.dtype)


def sensor_attention(x, gamma, beta, w1, b1, wf, bf, *,
                     kernel_size, dilation, eps=1e-5, batch_fold=None):
  """x: (B, T, D); w1: (F, 1, k, k); b1, wf: (F,); bf: (1,).

  Returns (x_ln * attn, attn), both (B, T, D)."""
  B, T, D = x.shape
  F = w1.shape[0]
  k = kernel_size
  pad = ((k - 1) * dilation) // 2          # 'same' padding (odd kernel_size)

  bt = batch_fold if batch_fold is not None else _pick_batch_fold(B, D)
  Bp = -(-B // bt) * bt                    # pad batch to a multiple of the fold
  if Bp != B:
    x = jnp.concatenate([x, jnp.zeros((Bp - B, T, D), x.dtype)], axis=0)
  G = Bp // bt                             # grid steps (>= 2 when B allows it)
  L = bt * D                               # lane width per block

  f32 = jnp.float32
  eye_bt = jnp.eye(bt, dtype=f32)

  # Fold batch into lanes: (Bp, T, D) -> (G, T, bt*D).  Pure layout plumbing.
  xt = x.reshape(G, bt, T, D).transpose(0, 2, 1, 3).reshape(G, T, L)

  # ---- parameter matrices (trace-time, tiny) ----
  gamma_l = jnp.tile(gamma.astype(f32).reshape(-1), bt).reshape(1, L)
  beta_l = jnp.tile(beta.astype(f32).reshape(-1), bt).reshape(1, L)
  # per-D segment-sum matrix (block-diagonal ones)
  seg = jnp.kron(eye_bt, jnp.ones((D, D), f32))                      # (L, L)
  # time-shift matrices: (tsh[i] @ x)[t] = x[t + i*dil - pad], zero out of range
  tsh = jnp.stack([jnp.eye(T, T, k=i * dilation - pad, dtype=f32)
                   for i in range(k)])                               # (k, T, T)
  # D-direction band matrices: band[j][d_in, d_out] = 1 iff d_in = d_out + j*dil - pad
  bands = jnp.stack([jnp.eye(D, D, k=pad - j * dilation, dtype=f32)
                     for j in range(k)])                             # (k, D, D)
  w1m = w1.astype(f32).reshape(F, k, k)
  w_taps = []
  for i in range(k):
    blk = jnp.einsum('fj,jab->fab', w1m[:, i, :], bands)             # (F, D, D)
    w_taps.append(jnp.concatenate(
        [jnp.kron(eye_bt, blk[f]) for f in range(F)], axis=1))       # (L, F*L)
  w_taps = jnp.stack(w_taps)                                         # (k, L, F*L)
  b1_l = jnp.repeat(b1.astype(f32), L).reshape(1, F * L)             # filter-major
  w1x1 = jnp.kron(wf.astype(f32).reshape(F, 1), jnp.eye(L, dtype=f32))  # (F*L, L)
  bf_s = bf.astype(f32).reshape(1)

  kernel = functools.partial(
      sensor_attention_kernel,
      ksize=k, dilation=dilation, pad=pad, embd=D, eps=eps)

  def full(shape):
    return pl.BlockSpec(shape, lambda g, s=shape: (0,) * len(s))

  out_t, attn_t = pl.pallas_call(
      kernel,
      out_shape=(jax.ShapeDtypeStruct((G, T, L), x.dtype),
                 jax.ShapeDtypeStruct((G, T, L), x.dtype)),
      grid_spec=pltpu.PrefetchScalarGridSpec(
          num_scalar_prefetch=0,
          grid=(G,),
          in_specs=[
              pl.BlockSpec((1, T, L), lambda g: (g, 0, 0)),          # x (folded)
              full((1, L)),                                          # gamma
              full((1, L)),                                          # beta
              full((L, L)),                                          # segment ones
              full((k, T, T)),                                       # time shifts
              full((k, L, F * L)),                                   # conv weights
              full((F * L, L)),                                      # 1x1 weights
              full((1, F * L)),                                      # conv_1 bias
              pl.BlockSpec(memory_space=pltpu.MemorySpace.SMEM),     # conv_f bias
          ],
          out_specs=(pl.BlockSpec((1, T, L), lambda g: (g, 0, 0)),
                     pl.BlockSpec((1, T, L), lambda g: (g, 0, 0))),
      ),
      compiler_params=pltpu.CompilerParams(
          dimension_semantics=("parallel",),
          vmem_limit_bytes=40 * 1024 * 1024),
  )(xt, gamma_l, beta_l, seg, tsh, w_taps, w1x1, b1_l, bf_s)

  # Unfold lanes back to (B, T, D), dropping the batch padding.
  out = out_t.reshape(G, T, bt, D).transpose(0, 2, 1, 3).reshape(Bp, T, D)[:B]
  attn = attn_t.reshape(G, T, bt, D).transpose(0, 2, 1, 3).reshape(Bp, T, D)[:B]
  return out, attn


def reference(x, gamma, beta, w1, b1, wf, bf, *, dilation, eps=1e-5):
  mean = jnp.mean(x, axis=-1, keepdims=True)
  var = jnp.mean((x - mean) ** 2, axis=-1, keepdims=True)
  x_ln = (x - mean) / jnp.sqrt(var + eps) * gamma + beta
  x1 = x_ln[:, None, :, :]                                           # (B,1,T,D)
  k = w1.shape[-1]
  pad = ((k - 1) * dilation) // 2
  y = lax.conv_general_dilated(
      x1, w1, window_strides=(1, 1),
      padding=[(pad, pad), (pad, pad)],
      rhs_dilation=(dilation, dilation),
      dimension_numbers=("NCHW", "OIHW", "NCHW"))
  y = jnp.maximum(y + b1[None, :, None, None], 0.0)                  # (B,F,T,D)
  z = jnp.einsum("bftd,f->btd", y, wf) + bf[0]                       # (B,T,D)
  z = jax.nn.softmax(z, axis=1)                                      # over T
  return x_ln * z, z


if __name__ == "__main__":
  B, T, D = 8, 16, 32              # batch, time, embd (sensors)
  n_filters, kernel_size, dilation = 4, 3, 2

  key = jax.random.PRNGKey(0)
  ks = jax.random.split(key, 7)
  x = jax.random.normal(ks[0], (B, T, D), jnp.float32)
  gamma = 1.0 + 0.1 * jax.random.normal(ks[1], (D,), jnp.float32)
  beta = 0.1 * jax.random.normal(ks[2], (D,), jnp.float32)
  w1 = 0.3 * jax.random.normal(ks[3], (n_filters, 1, kernel_size, kernel_size),
                               jnp.float32)
  b1 = 0.1 * jax.random.normal(ks[4], (n_filters,), jnp.float32)
  wf = 0.3 * jax.random.normal(ks[5], (n_filters,), jnp.float32)
  bf = 0.1 * jax.random.normal(ks[6], (1,), jnp.float32)

  out, attn = sensor_attention(x, gamma, beta, w1, b1, wf, bf,
                               kernel_size=kernel_size, dilation=dilation)
  jax.block_until_ready((out, attn))

  out_ref, attn_ref = reference(x, gamma, beta, w1, b1, wf, bf,
                                dilation=dilation)
  assert jnp.allclose(attn, attn_ref, atol=1e-3, rtol=1e-3), "attn mismatch"
  assert jnp.allclose(out, out_ref, atol=1e-3, rtol=1e-3), "output mismatch"

  print("KERNEL_OK")
</pallas_src>

<mosaic_0001>
module attributes {stable_mosaic.version = 11 : i64} {
  func.func @sensor_attention_kernel(%arg0: i32, %arg1: memref<1x16x128xf32, #tpu.memory_space<vmem>>, %arg2: memref<1x128xf32, #tpu.memory_space<vmem>>, %arg3: memref<1x128xf32, #tpu.memory_space<vmem>>, %arg4: memref<128x128xf32, #tpu.memory_space<vmem>>, %arg5: memref<3x16x16xf32, #tpu.memory_space<vmem>>, %arg6: memref<3x128x512xf32, #tpu.memory_space<vmem>>, %arg7: memref<512x128xf32, #tpu.memory_space<vmem>>, %arg8: memref<1x512xf32, #tpu.memory_space<vmem>>, %arg9: memref<1xf32, #tpu.memory_space<smem>>, %arg10: memref<1x16x128xf32, #tpu.memory_space<vmem>>, %arg11: memref<1x16x128xf32, #tpu.memory_space<vmem>>) attributes {dimension_semantics = [#tpu.dimension_semantics<parallel>], iteration_bounds = array<i64: 2>, scalar_prefetch = 0 : i64, scratch_operands = 0 : i64, tpu.core_type = #tpu.core_type<tc>, window_params = [{transform_indices = @transform_0, window_bounds = array<i64: 1, 16, 128>}, {pipeline_mode = #tpu.pipeline_mode<synchronous>, transform_indices = @transform_1, window_bounds = array<i64: 1, 128>}, {pipeline_mode = #tpu.pipeline_mode<synchronous>, transform_indices = @transform_2, window_bounds = array<i64: 1, 128>}, {pipeline_mode = #tpu.pipeline_mode<synchronous>, transform_indices = @transform_3, window_bounds = array<i64: 128, 128>}, {pipeline_mode = #tpu.pipeline_mode<synchronous>, transform_indices = @transform_4, window_bounds = array<i64: 3, 16, 16>}, {pipeline_mode = #tpu.pipeline_mode<synchronous>, transform_indices = @transform_5, window_bounds = array<i64: 3, 128, 512>}, {pipeline_mode = #tpu.pipeline_mode<synchronous>, transform_indices = @transform_6, window_bounds = array<i64: 512, 128>}, {pipeline_mode = #tpu.pipeline_mode<synchronous>, transform_indices = @transform_7, window_bounds = array<i64: 1, 512>}, {transform_indices = @transform_8, window_bounds = array<i64: 1>}, {transform_indices = @transform_9, window_bounds = array<i64: 1, 16, 128>}, {transform_indices = @transform_10, window_bounds = array<i64: 1, 16, 128>}]} {
    %c0 = arith.constant 0 : index
    %c0_0 = arith.constant 0 : index
    %c0_1 = arith.constant 0 : index
    %0 = vector.load %arg1[%c0, %c0_0, %c0_1] : memref<1x16x128xf32, #tpu.memory_space<vmem>>, vector<1x16x128xf32>
    %1 = vector.shape_cast %0 : vector<1x16x128xf32> to vector<16x128xf32>
    %c0_2 = arith.constant 0 : index
    %c0_3 = arith.constant 0 : index
    %2 = vector.load %arg4[%c0_2, %c0_3] : memref<128x128xf32, #tpu.memory_space<vmem>>, vector<128x128xf32>
    %cst = arith.constant dense<0.000000e+00> : vector<16x128xf32>
    %3 = tpu.matmul %1, %2, %cst {dimension_numbers = #tpu.dot_dimension_numbers<[1], [0], [0], [1], [0, 0, 1, 1], [], []>} : vector<16x128xf32>, vector<128x128xf32>, vector<16x128xf32> -> vector<16x128xf32>
    %cst_4 = arith.constant 3.125000e-02 : f32
    %4 = vector.broadcast %cst_4 : f32 to vector<16x128xf32>
    %5 = arith.mulf %3, %4 : vector<16x128xf32>
    %6 = arith.subf %1, %5 : vector<16x128xf32>
    %7 = arith.mulf %6, %6 : vector<16x128xf32>
    %cst_5 = arith.constant dense<0.000000e+00> : vector<16x128xf32>
    %8 = tpu.matmul %7, %2, %cst_5 {dimension_numbers = #tpu.dot_dimension_numbers<[1], [0], [0], [1], [0, 0, 1, 1], [], []>} : vector<16x128xf32>, vector<128x128xf32>, vector<16x128xf32> -> vector<16x128xf32>
    %cst_6 = arith.constant 3.125000e-02 : f32
    %9 = vector.broadcast %cst_6 : f32 to vector<16x128xf32>
    %10 = arith.mulf %8, %9 : vector<16x128xf32>
    %cst_7 = arith.constant 9.99999974E-6 : f32
    %11 = vector.broadcast %cst_7 : f32 to vector<16x128xf32>
    %12 = arith.addf %10, %11 : vector<16x128xf32>
    %13 = math.rsqrt %12 : vector<16x128xf32>
    %14 = arith.mulf %6, %13 : vector<16x128xf32>
    %c0_8 = arith.constant 0 : index
    %c0_9 = arith.constant 0 : index
    %15 = vector.load %arg2[%c0_8, %c0_9] : memref<1x128xf32, #tpu.memory_space<vmem>>, vector<1x128xf32>
    %16 = vector.broadcast %15 : vector<1x128xf32> to vector<16x128xf32>
    %17 = arith.mulf %14, %16 : vector<16x128xf32>
    %c0_10 = arith.constant 0 : index
    %c0_11 = arith.constant 0 : index
    %18 = vector.load %arg3[%c0_10, %c0_11] : memref<1x128xf32, #tpu.memory_space<vmem>>, vector<1x128xf32>
    %19 = vector.broadcast %18 : vector<1x128xf32> to vector<16x128xf32>
    %20 = arith.addf %17, %19 : vector<16x128xf32>
    %c0_12 = arith.constant 0 : index
    %c0_13 = arith.constant 0 : index
    %c0_14 = arith.constant 0 : index
    %21 = vector.load %arg5[%c0_12, %c0_13, %c0_14] : memref<3x16x16xf32, #tpu.memory_space<vmem>>, vector<1x16x16xf32>
    %22 = vector.shape_cast %21 : vector<1x16x16xf32> to vector<16x16xf32>
    %cst_15 = arith.constant dense<0.000000e+00> : vector<16x128xf32>
    %23 = tpu.matmul %22, %20, %cst_15 {dimension_numbers = #tpu.dot_dimension_numbers<[1], [0], [0], [1], [0, 0, 1, 1], [], []>} : vector<16x16xf32>, vector<16x128xf32>, vector<16x128xf32> -> vector<16x128xf32>
    %c0_16 = arith.constant 0 : index
    %c0_17 = arith.constant 0 : index
    %c0_18 = arith.constant 0 : index
    %24 = vector.load %arg6[%c0_16, %c0_17, %c0_18] : memref<3x128x512xf32, #tpu.memory_space<vmem>>, vector<1x128x512xf32>
    %25 = vector.shape_cast %24 : vector<1x128x512xf32> to vector<128x512xf32>
    %cst_19 = arith.constant dense<0.000000e+00> : vector<16x512xf32>
    %26 = tpu.matmul %23, %25, %cst_19 {dimension_numbers = #tpu.dot_dimension_numbers<[1], [0], [0], [1], [0, 0, 1, 1], [], []>} : vector<16x128xf32>, vector<128x512xf32>, vector<16x512xf32> -> vector<16x512xf32>
    %c1 = arith.constant 1 : index
    %c0_20 = arith.constant 0 : index
    %c0_21 = arith.constant 0 : index
    %27 = vector.load %arg6[%c1, %c0_20, %c0_21] : memref<3x128x512xf32, #tpu.memory_space<vmem>>, vector<1x128x512xf32>
    %28 = vector.shape_cast %27 : vector<1x128x512xf32> to vector<128x512xf32>
    %cst_22 = arith.constant dense<0.000000e+00> : vector<16x512xf32>
    %29 = tpu.matmul %20, %28, %cst_22 {dimension_numbers = #tpu.dot_dimension_numbers<[1], [0], [0], [1], [0, 0, 1, 1], [], []>} : vector<16x128xf32>, vector<128x512xf32>, vector<16x512xf32> -> vector<16x512xf32>
    %30 = arith.addf %26, %29 : vector<16x512xf32>
    %c2 = arith.constant 2 : index
    %c0_23 = arith.constant 0 : index
    %c0_24 = arith.constant 0 : index
    %31 = vector.load %arg5[%c2, %c0_23, %c0_24] : memref<3x16x16xf32, #tpu.memory_space<vmem>>, vector<1x16x16xf32>
    %32 = vector.shape_cast %31 : vector<1x16x16xf32> to vector<16x16xf32>
    %cst_25 = arith.constant dense<0.000000e+00> : vector<16x128xf32>
    %33 = tpu.matmul %32, %20, %cst_25 {dimension_numbers = #tpu.dot_dimension_numbers<[1], [0], [0], [1], [0, 0, 1, 1], [], []>} : vector<16x16xf32>, vector<16x128xf32>, vector<16x128xf32> -> vector<16x128xf32>
    %c2_26 = arith.constant 2 : index
    %c0_27 = arith.constant 0 : index
    %c0_28 = arith.constant 0 : index
    %34 = vector.load %arg6[%c2_26, %c0_27, %c0_28] : memref<3x128x512xf32, #tpu.memory_space<vmem>>, vector<1x128x512xf32>
    %35 = vector.shape_cast %34 : vector<1x128x512xf32> to vector<128x512xf32>
    %cst_29 = arith.constant dense<0.000000e+00> : vector<16x512xf32>
    %36 = tpu.matmul %33, %35, %cst_29 {dimension_numbers = #tpu.dot_dimension_numbers<[1], [0], [0], [1], [0, 0, 1, 1], [], []>} : vector<16x128xf32>, vector<128x512xf32>, vector<16x512xf32> -> vector<16x512xf32>
    %37 = arith.addf %30, %36 : vector<16x512xf32>
    %c0_30 = arith.constant 0 : index
    %c0_31 = arith.constant 0 : index
    %38 = vector.load %arg8[%c0_30, %c0_31] : memref<1x512xf32, #tpu.memory_space<vmem>>, vector<1x512xf32>
    %39 = vector.broadcast %38 : vector<1x512xf32> to vector<16x512xf32>
    %40 = arith.addf %37, %39 : vector<16x512xf32>
    %cst_32 = arith.constant 0.000000e+00 : f32
    %41 = vector.broadcast %cst_32 : f32 to vector<16x512xf32>
    %42 = arith.maximumf %40, %41 : vector<16x512xf32>
    %c0_33 = arith.constant 0 : index
    %c0_34 = arith.constant 0 : index
    %43 = vector.load %arg7[%c0_33, %c0_34] : memref<512x128xf32, #tpu.memory_space<vmem>>, vector<512x128xf32>
    %cst_35 = arith.constant dense<0.000000e+00> : vector<16x128xf32>
    %44 = tpu.matmul %42, %43, %cst_35 {dimension_numbers = #tpu.dot_dimension_numbers<[1], [0], [0], [1], [0, 0, 1, 1], [], []>} : vector<16x512xf32>, vector<512x128xf32>, vector<16x128xf32> -> vector<16x128xf32>
    %c0_36 = arith.constant 0 : index
    %45 = memref.load %arg9[%c0_36] : memref<1xf32, #tpu.memory_space<smem>>
    %46 = vector.broadcast %45 : f32 to vector<16x128xf32>
    %47 = arith.addf %44, %46 : vector<16x128xf32>
    %cst_37 = arith.constant dense<0xFF800000> : vector<128xf32>
    %48 = vector.multi_reduction <maximumf>, %47, %cst_37 [0] : vector<16x128xf32> to vector<128xf32>
    %49 = vector.shape_cast %48 : vector<128xf32> to vector<1x128xf32>
    %50 = vector.broadcast %49 : vector<1x128xf32> to vector<16x128xf32>
    %51 = arith.subf %47, %50 : vector<16x128xf32>
    %52 = math.exp %51 : vector<16x128xf32>
    %cst_38 = arith.constant dense<0.000000e+00> : vector<128xf32>
    %53 = vector.multi_reduction <add>, %52, %cst_38 [0] : vector<16x128xf32> to vector<128xf32>
    %54 = vector.shape_cast %53 : vector<128xf32> to vector<1x128xf32>
    %cst_39 = arith.constant 1.000000e+00 : f32
    %55 = vector.broadcast %cst_39 : f32 to vector<1x128xf32>
    %56 = arith.divf %55, %54 : vector<1x128xf32>
    %57 = vector.broadcast %56 : vector<1x128xf32> to vector<16x128xf32>
    %58 = arith.mulf %52, %57 : vector<16x128xf32>
    %c0_40 = arith.constant 0 : index
    %c0_41 = arith.constant 0 : index
    %c0_42 = arith.constant 0 : index
    %59 = vector.load %arg11[%c0_40, %c0_41, %c0_42] : memref<1x16x128xf32, #tpu.memory_space<vmem>>, vector<1x16x128xf32>
    %60 = vector.shape_cast %59 : vector<1x16x128xf32> to vector<16x128xf32>
    %61 = vector.shape_cast %58 : vector<16x128xf32> to vector<1x16x128xf32>
    tpu.vector_store %arg11[%c0_40, %c0_41, %c0_42], %61 {strides = array<i32>} : memref<1x16x128xf32, #tpu.memory_space<vmem>>, vector<1x16x128xf32>,
    %62 = arith.mulf %20, %58 : vector<16x128xf32>
    %c0_43 = arith.constant 0 : index
    %c0_44 = arith.constant 0 : index
    %c0_45 = arith.constant 0 : index
    %63 = vector.load %arg10[%c0_43, %c0_44, %c0_45] : memref<1x16x128xf32, #tpu.memory_space<vmem>>, vector<1x16x128xf32>
    %64 = vector.shape_cast %63 : vector<1x16x128xf32> to vector<16x128xf32>
    %65 = vector.shape_cast %62 : vector<16x128xf32> to vector<1x16x128xf32>
    tpu.vector_store %arg10[%c0_43, %c0_44, %c0_45], %65 {strides = array<i32>} : memref<1x16x128xf32, #tpu.memory_space<vmem>>, vector<1x16x128xf32>,
    return
  }
  func.func @transform_0(%arg0: i32) -> (i32, i32, i32) {
    %c0_i32 = arith.constant 0 : i32
    %c0_i32_0 = arith.constant 0 : i32
    %c0_i32_1 = arith.constant 0 : i32
    return %arg0, %c0_i32, %c0_i32_0 : i32, i32, i32
  }
  func.func @transform_1(%arg0: i32) -> (i32, i32) {
    %c0_i32 = arith.constant 0 : i32
    %c0_i32_0 = arith.constant 0 : i32
    %c0_i32_1 = arith.constant 0 : i32
    return %c0_i32, %c0_i32_0 : i32, i32
  }
  func.func @transform_2(%arg0: i32) -> (i32, i32) {
    %c0_i32 = arith.constant 0 : i32
    %c0_i32_0 = arith.constant 0 : i32
    %c0_i32_1 = arith.constant 0 : i32
    return %c0_i32, %c0_i32_0 : i32, i32
  }
  func.func @transform_3(%arg0: i32) -> (i32, i32) {
    %c0_i32 = arith.constant 0 : i32
    %c0_i32_0 = arith.constant 0 : i32
    %c0_i32_1 = arith.constant 0 : i32
    return %c0_i32, %c0_i32_0 : i32, i32
  }
  func.func @transform_4(%arg0: i32) -> (i32, i32, i32) {
    %c0_i32 = arith.constant 0 : i32
    %c0_i32_0 = arith.constant 0 : i32
    %c0_i32_1 = arith.constant 0 : i32
    %c0_i32_2 = arith.constant 0 : i32
    return %c0_i32, %c0_i32_0, %c0_i32_1 : i32, i32, i32
  }
  func.func @transform_5(%arg0: i32) -> (i32, i32, i32) {
    %c0_i32 = arith.constant 0 : i32
    %c0_i32_0 = arith.constant 0 : i32
    %c0_i32_1 = arith.constant 0 : i32
    %c0_i32_2 = arith.constant 0 : i32
    return %c0_i32, %c0_i32_0, %c0_i32_1 : i32, i32, i32
  }
  func.func @transform_6(%arg0: i32) -> (i32, i32) {
    %c0_i32 = arith.constant 0 : i32
    %c0_i32_0 = arith.constant 0 : i32
    %c0_i32_1 = arith.constant 0 : i32
    return %c0_i32, %c0_i32_0 : i32, i32
  }
  func.func @transform_7(%arg0: i32) -> (i32, i32) {
    %c0_i32 = arith.constant 0 : i32
    %c0_i32_0 = arith.constant 0 : i32
    %c0_i32_1 = arith.constant 0 : i32
    return %c0_i32, %c0_i32_0 : i32, i32
  }
  func.func @transform_8(%arg0: i32) -> i32 {
    %c0_i32 = arith.constant 0 : i32
    %c0_i32_0 = arith.constant 0 : i32
    return %c0_i32 : i32
  }
  func.func @transform_9(%arg0: i32) -> (i32, i32, i32) {
    %c0_i32 = arith.constant 0 : i32
    %c0_i32_0 = arith.constant 0 : i32
    %c0_i32_1 = arith.constant 0 : i32
    return %arg0, %c0_i32, %c0_i32_0 : i32, i32, i32
  }
  func.func @transform_10(%arg0: i32) -> (i32, i32, i32) {
    %c0_i32 = arith.constant 0 : i32
    %c0_i32_0 = arith.constant 0 : i32
    %c0_i32_1 = arith.constant 0 : i32
    return %arg0, %c0_i32, %c0_i32_0 : i32, i32, i32
  }
}

</mosaic_0001>

<bundles_post_ra>
// kernel: tpu_custom_call.1
= control target key start
LH: loop header
LB: loop body
LE: loop exit
PB: predicated region body
PF: predicated region fallthrough
CT: control target
= control target key end

     0   :  { %s2295_s0 = inlined_call_operand.hbm [shape: f32[2,16,128], index: 0, kind: input, shape index: {}]   ;;  %s2296_s1 = inlined_call_operand.vmem [shape: f32[1,128], index: 1, kind: input, shape index: {}]   ;;  %s2297_s2 = inlined_call_operand.vmem [shape: f32[1,128], index: 2, kind: input, shape index: {}]   ;;  %s2298_s3 = inlined_call_operand.hbm [shape: f32[128,128], index: 3, kind: input, shape index: {}]   ;;  %s2299_s4 = inlined_call_operand.hbm [shape: f32[3,16,16], index: 4, kind: input, shape index: {}]   ;;  %s2300_s5 = inlined_call_operand.hbm [shape: f32[3,128,512], index: 5, kind: input, shape index: {}]   ;;  %s2301_s6 = inlined_call_operand.hbm [shape: f32[512,128], index: 6, kind: input, shape index: {}]   ;;  %s2302_s7 = inlined_call_operand.vmem [shape: f32[1,512], index: 7, kind: input, shape index: {}]   ;;  %s2303_s8 = inlined_call_operand.<no memory space> [shape: f32[1], index: 8, kind: input, shape index: {}]   ;;  %s2304_s9 = inlined_call_operand.hbm [shape: f32[2,16,128], index: 9, kind: output, shape index: {0}]   ;;  %s2305_s10 = inlined_call_operand.hbm [shape: f32[2,16,128], index: 10, kind: output, shape index: {1}]  }
   0x1   :  { %2310 = sst [smem:[#allocation21_spill]] %s2298_s3 }
   0x2   :  { %2311 = sst [smem:[#allocation22_spill]] %s2299_s4 }
   0x3   :  { %2312 = sst [smem:[#allocation23_spill]] %s2300_s5 }
   0x4   :  { %2313 = sst [smem:[#allocation24_spill]] %s2301_s6 }
   0x5   :  { %16 = sst [smem:[#allocation2]] %s2303_s8 }
   0x6   :  { %17 = vsyncpa [#allocation4], 0 }
   0x7   :  { %19 = vsyncpa [#allocation4 + $0x1], 0 }
   0x8   :  { %20 = vsyncpa [#allocation7], 0 }
   0x9   :  { %21 = vsyncpa [#allocation10], 0 }
   0xa   :  { %22 = vsyncpa [#allocation5], 0 }
   0xb   :  { %24 = vsyncpa [#allocation5 + $0x1], 0 }
   0xc   :  { %25 = vsyncpa [#allocation14], 0 }
   0xd   :  { %27 = vsyncpa [#allocation14 + $0x1], 0  ;;  %s2002_s15 = smov 0   ;;  %s2004_s16 = smov 0  }
   0xe   :  { %s2006_s17 = smov 0   ;;  %s2008_s18 = smov 0  }
   0xf LB: > { %s2023_s8 = sadd.s32 4294967295, %s1932_s18   ;;  %s1517_s19 = sadd.s32 4294967294, %s1932_s18   ;;  %s1932_s18 = sphi %s2008_s18, %s2332_s18   ;;  %s1928_s17 = sphi %s2006_s17, %s2331_s17   ;;  %s1924_s16 = sphi %s2004_s16, %s2330_s16   ;;  %s1920_s15 = sphi %s2002_s15, %s2329_s15  }
  0x10   : > { %p53_p0 = scmp.ne.s32.totalorder %s1924_s16, %s1920_s15  ;;  %p54_p1 = scmp.eq.s32.totalorder %s2023_s8, 0 }
  0x11   : > { %p245_p2 = scmp.eq.s32.totalorder %s2023_s8, 1  ;;  %p251_p3 = scmp.eq.s32.totalorder %s1517_s19, 1 }
  0x12   : > { %p2032_p4 = por %p54_p1, %p53_p0  ;;  %p1518_p5 = scmp.ge.s32.totalorder %s1932_s18, 1 }
  0x13   : > { %p2037_p6 = por %p251_p3, %p53_p0  ;;  %p284_p7 = scmp.lt.s32.totalorder %s1932_s18, 3 }
  0x14   : > { %s2316_s3 = sld [smem:[#allocation21_spill]]  ;;  %s1934_s26 = smov [#allocation6]  }
  0x15   : > { %p2045_p8 = pnand %p1518_p5, %p284_p7  ;;  %s303_s27 = sshll.u32 %s1934_s26, 4  ;;  %s304_s27 = int_to_ptr.vmem [resolvable:$true] %s303_s27 }
  0x16   : > { %s2319_s5 = sld [smem:[#allocation23_spill]]  ;;  %s2306_s12 = smov 128  }
  0x17   : > { %p1588_p9 = pneg %p2045_p8  ;;  %s2308_s13 = smov 8  }
  0x18   : > { %s1937_s14 = smov [#allocation9]   ;;  %s1938_s22 = smov 512  }
  0x19   : > { %p2053_p10 = pnand %p1588_p9, %p54_p1  ;;  %s331_s19 = sshll.u32 %s1937_s14, 4  ;;  %s332_s19 = int_to_ptr.vmem [resolvable:$true] %s331_s19 }
  0x1a   : > { %s301_s24 = sshll.u32 %s2316_s3, 4  ;;  %s1939_s23 = smov 32   ;;  %s302_s24 = int_to_ptr.hbm [resolvable:$true] %s301_s24 }
  0x1b   : > { %1591 = dma.hbm_to_vmem [thread:$0]  (!%p2053_p10), %s302_s24, 2048, %s304_s27, [#allocation7], %s2306_s12, %s2306_s12, %s2308_s13  }
  0x1c   : > { %s329_s11 = sshll.u32 %s2319_s5, 4  ;;  %s2320_s4 = sld [smem:[#allocation22_spill]]  ;;  %s330_s11 = int_to_ptr.hbm [resolvable:$true] %s329_s11 }
  0x1d   : > { %1597 = dma.hbm_to_vmem [thread:$0]  (!%p2053_p10), %s330_s11, 24576, %s332_s19, [#allocation10], %s1938_s22, %s1938_s22, %s1939_s23  }
  0x1e   : > { %s1940_s24 = smov [#allocation8]   ;;  %s2321_s6 = sld [smem:[#allocation24_spill]] }
  0x1f   : > { %s317_s27 = sshll.u32 %s1940_s24, 4  ;;  %s2322_s11 = smov 8   ;;  %s318_s27 = int_to_ptr.vmem [resolvable:$true] %s317_s27 }
  0x20   : > { %s2323_s19 = smov 128   ;;  %s1941_s22 = smov [#allocation11]  }
  0x21   : > { %s345_s23 = sshll.u32 %s1941_s22, 4  ;;  %s2085_s26 = sadd.s32 1, %s1932_s18   ;;  %s346_s23 = int_to_ptr.vmem [resolvable:$true] %s345_s23 }
  0x22   : > { %s315_s30 = sshll.u32 %s2320_s4, 4  ;;  %s40_s12 = sadd.s32 1, %s1928_s17  ;;  %s316_s30 = int_to_ptr.hbm [resolvable:$true] %s315_s30 }
  0x23   : > { %1594 = dma.hbm_to_vmem [thread:$0]  (!%p2053_p10), %s316_s30, 768, %s318_s27, [#allocation7], %s2323_s19, %s2323_s19, %s2322_s11  }
  0x24   : > { %s343_s13 = sshll.u32 %s2321_s6, 4  ;;  %s37_s29 = ssub.s32 %s1932_s18, %s2085_s26  ;;  %s344_s13 = int_to_ptr.hbm [resolvable:$true] %s343_s13 }
  0x25   : > { %1600 = dma.hbm_to_vmem [thread:$0]  (!%p2053_p10), %s344_s13, 8192, %s346_s23, [#allocation10], %s2323_s19, %s2323_s19, %s2322_s11  }
  0x26   : > { %p47_p12 = scmp.ne.s32.totalorder %s1928_s17, %s1924_s16  ;;  %p38_p13 = scmp.eq.s32.totalorder %s37_s29, 0 }
  0x27   : > { %p48_p0 = scmp.eq.s32.totalorder %s1932_s18, 0  ;;  %p1616_p5 = scmp.lt.s32.totalorder %s1932_s18, 2 }
  0x28   : > { %p2095_p3 = por %p245_p2, %p47_p12  ;;  %s365_s28 = sand.u32 1, %s1928_s17  }
  0x29   : > { %s2101_s24 = scalar_select %p38_p13, %s1928_s17, %s40_s12  }
  0x2a   : > { %p49_p7 = por %p48_p0, %p47_p12  ;;  %s1524_s27 = sshll.u32 %s365_s28, 4 }
  0x2b   : > { %2325 = sst [smem:[#allocation20_spill]] %s2101_s24  ;;  %s1547_s13 = sshll.u32 %s1932_s18, 4 }
  0x2c   : > { %s374_s23 = scalar_lea.hbm %s2295_s0, %s1547_s13  ;;  %s369_s3 = scalar_lea.vmem [#allocation3], %s1524_s27 }
  0x2d   : > { %s377_s4 = sshll.u32 %s369_s3, 4  ;;  %s375_s29 = sshll.u32 %s374_s23, 4  ;;  %s378_s4 = int_to_ptr.vmem [resolvable:$true] %s377_s4  ;;  %s376_s29 = int_to_ptr.hbm [resolvable:$true] %s375_s29 }
  0x2e   : > { %p2108_p2 = pnand %p1616_p5, %p49_p7  ;;  %s366_s12 = scalar_lea.sflag [#allocation4], %s365_s28 }
  0x2f   : > { %s1796_s6 = sshra.s32 %s376_s29, 4  ;;  %s1803_s3 = scalar_lea.hbm %s2295_s0, 32  ;;  %s1797_s6 = int_to_ptr.hbm [resolvable:$true] %s1796_s6 }
  0x30   : > { %s1798_s24 = scalar_lea.hbm %s1797_s6, 16  ;;  %p1800_p10 = pneg %p2108_p2 }
  0x31   : > { %p1799_p9 = scmp.ne.s32.totalorder %s1797_s6, %s1798_s24  ;;  %p1804_p0 = scmp.lt.s32.totalorder %s1797_s6, %s2295_s0 }
  0x32   : > { %p1805_p5 = scmp.lt.s32.totalorder %s1803_s3, %s1798_s24 }
  0x33   : > { %p1801_p12 = pnand %p1800_p10, %p1799_p9 }
  0x34   : > { %p1806_p7 = por %p1805_p5, %p1804_p0 }
  0x35   : > { %p1802_p13 = pneg %p1801_p12 }
  0x37   : > { %p1807_p11 = pnand %p1806_p7, %p1802_p13 }
  0x39   : > { %1810 = shalt.err (!%p1807_p11)
}
  0x3a   : > { %1604 = dma.hbm_to_vmem [thread:$0]  (!%p2108_p2), %s376_s29, 256, %s378_s4, %s366_s12, %s2323_s19, %s2323_s19, %s2322_s11  }
  0x3b   : > { %389 = sbr.rel (%p2045_p8) target bundleno = 1046 (0x416), region = 56  ;;  %s2128_s28 = sand.u32 (!%p2045_p8), 1, %s1924_s16  }
  0x3c   : > { %s2131_s6 = sshll.u32 (!%p2045_p8), %s2128_s28, 4  ;;  %s392_s24 = scalar_lea.sflag (!%p2045_p8), [#allocation4], %s2128_s28 }
  0x3d   : > { %s395_s23 = scalar_lea.vmem (!%p2045_p8), [#allocation3], %s2131_s6 }
  0x40   : > { %1899 = dma.done.wait (%p2032_p4), %s392_s24, 256  }
  0x41   : > { %1901 = vsyncadd (%p2032_p4), %s392_s24, 4294967040 }
  0x42   : > { %1903 = dma.done.wait (%p54_p1), [#allocation7], 2816  }
  0x43   : > { %1905 = vsyncadd (%p54_p1), [#allocation7], 4294964480 }
  0x44   : > { %1907 = dma.done.wait (%p54_p1), [#allocation10], 32768  }
  0x45   : > { %1909 = vsyncadd (%p54_p1), [#allocation10], 4294934528  ;;  %v475_v0 = vld [vmem:[#allocation6 + $0x78] sm:$0xff]  ;;  %v474_v1 = vld [vmem:[#allocation6 + $0x70] sm:$0xff]  ;;  %vm568_vm6 = vcmask 130048   ;;  %s1198_s29 = sld [smem:[#allocation2]] }
  0x46   : > { %476 = vmatpush.msra.mxu0 %v475_v0  ;;  %505 = vmatpush.msra.mxu1 %v475_v0  ;;  %v473_v2 = vld [vmem:[#allocation6 + $0x68] sm:$0xff]  ;;  %v472_v3 = vld [vmem:[#allocation6 + $0x60] sm:$0xff]  ;;  %v471_v4 = vld [vmem:[#allocation6 + $0x58] sm:$0xff]  ;;  %s1548_s12 = sshll.u32 %s2023_s8, 4  ;;  %s450_s14 = scalar_lea.vmem [#allocation12], %s2131_s6 }
  0x47   : > { %v470_v5 = vld [vmem:[#allocation6 + $0x50] sm:$0xff]  ;;  %v469_v6 = vld [vmem:[#allocation6 + $0x48] sm:$0xff]  ;;  %v468_v7 = vld [vmem:[#allocation6 + $0x40] sm:$0xff]  ;;  %s1352_s3 = scalar_lea.hbm %s2304_s9, %s1548_s12  ;;  %s1353_s22 = sshll.u32 %s450_s14, 4  ;;  %s2242_s22 = int_to_ptr.vmem [resolvable:$true] %s1353_s22 }
  0x48   : > { %477 = vmatpush.msra.mxu0 %v474_v1  ;;  %506 = vmatpush.msra.mxu1 %v474_v1  ;;  %v467_v8 = vld [vmem:[#allocation6 + $0x38] sm:$0xff]  ;;  %v466_v9 = vld [vmem:[#allocation6 + $0x30] sm:$0xff]  ;;  %v465_v10 = vld [vmem:[#allocation6 + $0x28] sm:$0xff]  ;;  %s1369_s8 = scalar_lea.hbm %s2305_s10, %s1548_s12  ;;  %s1355_s4 = sshll.u32 %s1352_s3, 4  ;;  %s1356_s4 = int_to_ptr.hbm [resolvable:$true] %s1355_s4 }
  0x49   : > { %v464_v11 = vld [vmem:[#allocation6 + $0x20] sm:$0xff]  ;;  %v463_v12 = vld [vmem:[#allocation6 + $0x18] sm:$0xff]  ;;  %v462_v13 = vld [vmem:[#allocation6 + $0x10] sm:$0xff]  ;;  %s457_s5 = scalar_lea.vmem [#allocation13], %s2131_s6  ;;  %s1372_s25 = sshll.u32 %s1369_s8, 4  ;;  %s2249_s25 = int_to_ptr.hbm [resolvable:$true] %s1372_s25 }
  0x4a   : > { %478 = vmatpush.msra.mxu0 %v473_v2  ;;  %507 = vmatpush.msra.mxu1 %v473_v2  ;;  %v461_v14 = vld [vmem:[#allocation6 + $0x8] sm:$0xff]  ;;  %v460_v15 = vld [vmem:[#allocation6] sm:$0xff]  ;;  %v723_v18 = vld [vmem:[#allocation9 + $0x3e0] sm:$0xff]  ;;  %s1370_s20 = sshll.u32 %s457_s5, 4  ;;  %s1336_s11 = scalar_lea.sflag [#allocation5], %s2128_s28  ;;  %s2247_s20 = int_to_ptr.vmem [resolvable:$true] %s1370_s20 }
  0x4b   : > { %v458_v16 = vld [vmem:[%s395_s23] sm:$0xff]  ;;  %v459_v17 = vld [vmem:[%s395_s23 + $0x8] sm:$0xff]  ;;  %727 = vmatpush.msra.mxu3 %v723_v18  ;;  %s1840_s19 = sshra.s32 %s1356_s4, 4  ;;  %s1846_s13 = scalar_lea.hbm %s2304_s9, 32  ;;  %s1841_s19 = int_to_ptr.hbm [resolvable:$true] %s1840_s19 }
  0x4c   : > { %479 = vmatpush.msra.mxu0 %v472_v3  ;;  %508 = vmatpush.msra.mxu1 %v472_v3  ;;  %v719_v19 = vld [vmem:[#allocation9 + $0x3c0] sm:$0xff]  ;;  %v725_v22 = vld [vmem:[#allocation9 + $0x3f0] sm:$0xff]  ;;  %v726_v23 = vld [vmem:[#allocation9 + $0x3f8] sm:$0xff]  ;;  %s1842_s6 = scalar_lea.hbm %s1841_s19, 16  ;;  %p1847_p11 = scmp.lt.s32.totalorder %s1841_s19, %s2304_s9 }
  0x4d   : > { %v715_v20 = vld [vmem:[#allocation9 + $0x3a0] sm:$0xff]  ;;  %728 = vmatpush.msra.mxu3 %v719_v19  ;;  %v721_v41 = vld [vmem:[#allocation9 + $0x3d0] sm:$0xff]  ;;  %v722_v42 = vld [vmem:[#allocation9 + $0x3d8] sm:$0xff]  ;;  %p1843_p1 = scmp.ne.s32.totalorder %s1841_s19, %s1842_s6  ;;  %p1848_p2 = scmp.lt.s32.totalorder %s1846_s13, %s1842_s6 }
  0x4e   : > { %480 = vmatpush.msra.mxu0 %v471_v4  ;;  %509 = vmatpush.msra.mxu1 %v471_v4  ;;  %v711_v21 = vld [vmem:[#allocation9 + $0x380] sm:$0xff]  ;;  %v717_v44 = vld [vmem:[#allocation9 + $0x3b0] sm:$0xff]  ;;  %v718_v45 = vld [vmem:[#allocation9 + $0x3b8] sm:$0xff] }
  0x4f   : > { %729 = vmatpush.msra.mxu3 %v715_v20  ;;  %v707_v24 = vld [vmem:[#allocation9 + $0x360] sm:$0xff]  ;;  %v713_v47 = vld [vmem:[#allocation9 + $0x390] sm:$0xff]  ;;  %v714_v48 = vld [vmem:[#allocation9 + $0x398] sm:$0xff]  ;;  %p1844_p4 = pnand %p1843_p1, %p2095_p3  ;;  %p1849_p9 = por %p1848_p2, %p1847_p11 }
  0x50   : > { %481 = vmatpush.msra.mxu0 %v470_v5  ;;  %510 = vmatpush.msra.mxu1 %v470_v5  ;;  %v703_v25 = vld [vmem:[#allocation9 + $0x340] sm:$0xff]  ;;  %v709_v50 = vld [vmem:[#allocation9 + $0x370] sm:$0xff]  ;;  %v710_v51 = vld [vmem:[#allocation9 + $0x378] sm:$0xff] }
  0x51   : > { %730 = vmatpush.msra.mxu3 %v711_v21  ;;  %v699_v26 = vld [vmem:[#allocation9 + $0x320] sm:$0xff]  ;;  %v705_v53 = vld [vmem:[#allocation9 + $0x350] sm:$0xff]  ;;  %v706_v54 = vld [vmem:[#allocation9 + $0x358] sm:$0xff]  ;;  %p1845_p8 = pneg %p1844_p4 }
  0x52   : > { %482 = vmatpush.msra.mxu0 %v469_v6  ;;  %511 = vmatpush.msra.mxu1 %v469_v6  ;;  %v695_v27 = vld [vmem:[#allocation9 + $0x300] sm:$0xff]  ;;  %v701_v56 = vld [vmem:[#allocation9 + $0x330] sm:$0xff]  ;;  %v702_v57 = vld [vmem:[#allocation9 + $0x338] sm:$0xff] }
  0x53   : > { %731 = vmatpush.msra.mxu3 %v707_v24  ;;  %v691_v28 = vld [vmem:[#allocation9 + $0x2e0] sm:$0xff]  ;;  %v697_v59 = vld [vmem:[#allocation9 + $0x310] sm:$0xff]  ;;  %v698_v60 = vld [vmem:[#allocation9 + $0x318] sm:$0xff]  ;;  %p1850_p10 = pnand %p1849_p9, %p1845_p8 }
  0x54   : > { %483 = vmatpush.msra.mxu0 %v468_v7  ;;  %512 = vmatpush.msra.mxu1 %v468_v7  ;;  %v687_v29 = vld [vmem:[#allocation9 + $0x2c0] sm:$0xff]  ;;  %v693_v62 = vld [vmem:[#allocation9 + $0x2f0] sm:$0xff]  ;;  %v694_v63 = vld [vmem:[#allocation9 + $0x2f8] sm:$0xff] }
  0x55   : > { %732 = vmatpush.msra.mxu3 %v703_v25  ;;  %v683_v32 = vld [vmem:[#allocation9 + $0x2a0] sm:$0xff]  ;;  %v689_v1 = vld [vmem:[#allocation9 + $0x2d0] sm:$0xff]  ;;  %v690_v2 = vld [vmem:[#allocation9 + $0x2d8] sm:$0xff] }
  0x56   : > { %484 = vmatpush.msra.mxu0 %v467_v8  ;;  %513 = vmatpush.msra.mxu1 %v467_v8  ;;  %v679_v34 = vld [vmem:[#allocation9 + $0x280] sm:$0xff]  ;;  %v685_v4 = vld [vmem:[#allocation9 + $0x2b0] sm:$0xff]  ;;  %v686_v5 = vld [vmem:[#allocation9 + $0x2b8] sm:$0xff] }
  0x57   : > { %733 = vmatpush.msra.mxu3 %v699_v26  ;;  %v675_v36 = vld [vmem:[#allocation9 + $0x260] sm:$0xff]  ;;  %v681_v7 = vld [vmem:[#allocation9 + $0x290] sm:$0xff]  ;;  %v682_v8 = vld [vmem:[#allocation9 + $0x298] sm:$0xff] }
  0x58   : > { %485 = vmatpush.msra.mxu0 %v466_v9  ;;  %514 = vmatpush.msra.mxu1 %v466_v9  ;;  %v671_v43 = vld [vmem:[#allocation9 + $0x240] sm:$0xff]  ;;  %v665_v19 = vld [vmem:[#allocation9 + $0x210] sm:$0xff]  ;;  %v666_v20 = vld [vmem:[#allocation9 + $0x218] sm:$0xff] }
  0x59   : > { %734 = vmatpush.msra.mxu3 %v695_v27  ;;  %v667_v46 = vld [vmem:[#allocation9 + $0x220] sm:$0xff] }
  0x5a   : > { %486 = vmatpush.msra.mxu0 %v465_v10  ;;  %515 = vmatpush.msra.mxu1 %v465_v10  ;;  %v663_v49 = vld [vmem:[#allocation9 + $0x200] sm:$0xff]  ;;  %v677_v10 = vld [vmem:[#allocation9 + $0x270] sm:$0xff] }
  0x5b   : > { %735 = vmatpush.msra.mxu3 %v691_v28  ;;  %v658_v52 = vld [vmem:[#allocation9 + $0x1e0] sm:$0xff] }
  0x5c   : > { %487 = vmatpush.msra.mxu0 %v464_v11  ;;  %516 = vmatpush.msra.mxu1 %v464_v11  ;;  %v654_v55 = vld [vmem:[#allocation9 + $0x1c0] sm:$0xff]  ;;  %v678_v11 = vld [vmem:[#allocation9 + $0x278] sm:$0xff] }
  0x5d   : > { %736 = vmatpush.msra.mxu3 %v687_v29  ;;  %v650_v58 = vld [vmem:[#allocation9 + $0x1a0] sm:$0xff] }
  0x5e   : > { %488 = vmatpush.msra.mxu0 %v463_v12  ;;  %517 = vmatpush.msra.mxu1 %v463_v12  ;;  %v646_v61 = vld [vmem:[#allocation9 + $0x180] sm:$0xff] }
  0x5f   : > { %737 = vmatpush.msra.mxu3 %v683_v32  ;;  %v642_v0 = vld [vmem:[#allocation9 + $0x160] sm:$0xff] }
  0x60   : > { %489 = vmatpush.msra.mxu0 %v462_v13  ;;  %518 = vmatpush.msra.mxu1 %v462_v13  ;;  %v638_v3 = vld [vmem:[#allocation9 + $0x140] sm:$0xff]  ;;  %v673_v13 = vld [vmem:[#allocation9 + $0x250] sm:$0xff] }
  0x61   : > { %738 = vmatpush.msra.mxu3 %v679_v34  ;;  %v634_v6 = vld [vmem:[#allocation9 + $0x120] sm:$0xff] }
  0x62   : > { %490 = vmatpush.msra.mxu0 %v461_v14  ;;  %519 = vmatpush.msra.mxu1 %v461_v14  ;;  %v630_v9 = vld [vmem:[#allocation9 + $0x100] sm:$0xff]  ;;  %v674_v14 = vld [vmem:[#allocation9 + $0x258] sm:$0xff] }
  0x63   : > { %739 = vmatpush.msra.mxu3 %v675_v36  ;;  %v626_v12 = vld [vmem:[#allocation9 + $0xe0] sm:$0xff] }
  0x64   : > { %491 = vmatpush.msra.mxu0 %v460_v15  ;;  %520 = vmatpush.msra.mxu1 %v460_v15  ;;  %v622_v15 = vld [vmem:[#allocation9 + $0xc0] sm:$0xff] }
  0x65   : > { %492 = vmatmul.f32.vlgmr.msra.gmra.mxu0 %v458_v16  ;;  %740 = vmatpush.msra.mxu3 %v671_v43  ;;  %v618_v18 = vld [vmem:[#allocation9 + $0xa0] sm:$0xff] }
  0x66   : > { %773 = vmatpush.msrb.mxu0 %v725_v22  ;;  %796 = vmatpush.msrb.mxu1 %v726_v23  ;;  %v614_v21 = vld [vmem:[#allocation9 + $0x80] sm:$0xff] }
  0x67   : > { %741 = vmatpush.msra.mxu3 %v667_v46  ;;  %v610_v22 = vld [vmem:[#allocation9 + $0x60] sm:$0xff]  ;;  %v1665_v46 = vld [vmem:[%s2297_s2] ss:$0 sm:$0xff] }
  0x68   : > { %774 = vmatpush.msrb.mxu0 %v721_v41  ;;  %797 = vmatpush.msrb.mxu1 %v722_v42  ;;  %v606_v24 = vld [vmem:[#allocation9 + $0x40] sm:$0xff]  ;;  %v1664_v42 = vld [vmem:[%s2296_s1] ss:$0 sm:$0xff] }
  0x69   : > { %742 = vmatpush.msra.mxu3 %v663_v49  ;;  %v602_v26 = vld [vmem:[#allocation9 + $0x20] sm:$0xff] }
  0x6a   : > { %775 = vmatpush.msrb.mxu0 %v717_v44  ;;  %798 = vmatpush.msrb.mxu1 %v718_v45  ;;  %v598_v28 = vld [vmem:[#allocation9] sm:$0xff] }
  0x6b   : > { %819 = vmatpush.msrb.mxu3 %v658_v52 }
  0x6c   : > { %776 = vmatpush.msrb.mxu0 %v713_v47  ;;  %799 = vmatpush.msrb.mxu1 %v714_v48 }
  0x6d   : > { %495 = vmatmul.f32.gmra.mxu0 %v459_v17  ;;  %820 = vmatpush.msrb.mxu3 %v654_v55  ;;  %v566_v55 = vld [vmem:[#allocation8] sm:$0xff] }
  0x6e   : > { %777 = vmatpush.msrb.mxu0 %v709_v50  ;;  %800 = vmatpush.msrb.mxu1 %v710_v51 }
  0x6f   : > { %821 = vmatpush.msrb.mxu3 %v650_v58  ;;  %v712_v58 = vld [vmem:[#allocation9 + $0x388] sm:$0xff] }
  0x70   : > { %778 = vmatpush.msrb.mxu0 %v705_v53  ;;  %801 = vmatpush.msrb.mxu1 %v706_v54 }
  0x71   : > { %822 = vmatpush.msrb.mxu3 %v646_v61  ;;  %v704_v61 = vld [vmem:[#allocation9 + $0x348] sm:$0xff] }
  0x72   : > { %779 = vmatpush.msrb.mxu0 %v701_v56  ;;  %802 = vmatpush.msrb.mxu1 %v702_v57  ;;  %v724_v56 = vld [vmem:[#allocation9 + $0x3e8] sm:$0xff] }
  0x73   : > { %823 = vmatpush.msrb.mxu3 %v642_v0  ;;  %v716_v57 = vld [vmem:[#allocation9 + $0x3a8] sm:$0xff]  ;;  %v656_v0 = vld [vmem:[#allocation9 + $0x1d0] sm:$0xff] }
  0x74   : > { %780 = vmatpush.msrb.mxu0 %v697_v59  ;;  %803 = vmatpush.msrb.mxu1 %v698_v60  ;;  %v567_v59 = vld [vmem:[#allocation8 + $0x8] sm:$0xff]  ;;  %v708_v60 = vld [vmem:[#allocation9 + $0x368] sm:$0xff] }
  0x75   : > { %824 = vmatpush.msrb.mxu3 %v638_v3  ;;  %v652_v3 = vld [vmem:[#allocation9 + $0x1b0] sm:$0xff] }
  0x76   : > { %781 = vmatpush.msrb.mxu0 %v693_v62  ;;  %804 = vmatpush.msrb.mxu1 %v694_v63  ;;  %v660_v62 = vld [vmem:[#allocation9 + $0x1f0] sm:$0xff]  ;;  %v661_v63 = vld [vmem:[#allocation9 + $0x1f8] sm:$0xff] }
  0x77   : > { %825 = vmatpush.msrb.mxu3 %v634_v6  ;;  %v648_v6 = vld [vmem:[#allocation9 + $0x190] sm:$0xff] }
  0x78   : > { %782 = vmatpush.msrb.mxu0 %v689_v1  ;;  %805 = vmatpush.msrb.mxu1 %v690_v2  ;;  %v657_v1 = vld [vmem:[#allocation9 + $0x1d8] sm:$0xff]  ;;  %v700_v2 = vld [vmem:[#allocation9 + $0x328] sm:$0xff] }
  0x79   : > { %826 = vmatpush.msrb.mxu3 %v630_v9  ;;  %v644_v9 = vld [vmem:[#allocation9 + $0x170] sm:$0xff] }
  0x7a   : > { %783 = vmatpush.msrb.mxu0 %v685_v4  ;;  %806 = vmatpush.msrb.mxu1 %v686_v5  ;;  %v653_v4 = vld [vmem:[#allocation9 + $0x1b8] sm:$0xff]  ;;  %v696_v5 = vld [vmem:[#allocation9 + $0x308] sm:$0xff] }
  0x7b   : > { %827 = vmatpush.msrb.mxu3 %v626_v12  ;;  %v640_v12 = vld [vmem:[#allocation9 + $0x150] sm:$0xff] }
  0x7c   : > { %784 = vmatpush.msrb.mxu0 %v681_v7  ;;  %807 = vmatpush.msrb.mxu1 %v682_v8  ;;  %v649_v7 = vld [vmem:[#allocation9 + $0x198] sm:$0xff]  ;;  %v692_v8 = vld [vmem:[#allocation9 + $0x2e8] sm:$0xff] }
  0x7d   : > { %828 = vmatpush.msrb.mxu3 %v622_v15  ;;  %v636_v15 = vld [vmem:[#allocation9 + $0x130] sm:$0xff] }
  0x7e   : > { %785 = vmatpush.msrb.mxu0 %v677_v10  ;;  %808 = vmatpush.msrb.mxu1 %v678_v11  ;;  %v645_v10 = vld [vmem:[#allocation9 + $0x178] sm:$0xff]  ;;  %v688_v11 = vld [vmem:[#allocation9 + $0x2c8] sm:$0xff] }
  0x7f   : > { %829 = vmatpush.msrb.mxu3 %v618_v18  ;;  %v676_v18 = vld [vmem:[#allocation9 + $0x268] sm:$0xff] }
  0x80   : > { %786 = vmatpush.msrb.mxu0 %v673_v13  ;;  %809 = vmatpush.msrb.mxu1 %v674_v14  ;;  %v641_v13 = vld [vmem:[#allocation9 + $0x158] sm:$0xff]  ;;  %v684_v14 = vld [vmem:[#allocation9 + $0x2a8] sm:$0xff] }
  0x81   : > { %830 = vmatpush.msrb.mxu3 %v614_v21  ;;  %v664_v21 = vld [vmem:[#allocation9 + $0x208] sm:$0xff] }
  0x83   : > { %831 = vmatpush.msrb.mxu3 %v610_v22  ;;  %v659_v22 = vld [vmem:[#allocation9 + $0x1e8] sm:$0xff] }
  0x85   : > { %832 = vmatpush.msrb.mxu3 %v606_v24  ;;  %v651_v24 = vld [vmem:[#allocation9 + $0x1a8] sm:$0xff] }
  0x87   : > { %833 = vmatpush.msrb.mxu3 %v602_v26  ;;  %v643_v26 = vld [vmem:[#allocation9 + $0x168] sm:$0xff] }
  0x89   : > { %834 = vmatpush.msrb.mxu3 %v598_v28  ;;  %v635_v28 = vld [vmem:[#allocation9 + $0x128] sm:$0xff] }
  0xe2   : > { %v493_v30 = vpop.f32.mrf.mxu0 }
  0xe3   : > { %v499_v31 = vmul.f32 0.03125, %v493_v30 }
  0xe5   : > { %v2151_v33 = vsub.f32 %v458_v16, %v499_v31  ;;  %v669_v16 = vld [vmem:[#allocation9 + $0x230] sm:$0xff] }
  0xe6   : > { %787 = vmatpush.msrb.mxu0 %v669_v16  ;;  %v637_v16 = vld [vmem:[#allocation9 + $0x138] sm:$0xff] }
  0xe7   : > { %v503_v35 = vmul.f32 %v2151_v33, %v2151_v33 }
  0xe8   : > { %788 = vmatpush.msrb.mxu0 %v665_v19  ;;  %v672_v19 = vld [vmem:[#allocation9 + $0x248] sm:$0xff] }
  0xe9   : > { %521 = vmatmul.f32.vlgmr.msra.gmra.mxu1 %v503_v35 }
  0xea   : > { %v496_v37 = vpop.f32.mrf.mxu0  ;;  %865 = vmatpush.msra.mxu0 %v660_v62  ;;  %v1006_v62 = vld [vmem:[#allocation9 + $0x5f0] sm:$0xff] }
  0xeb   : > { %v500_v38 = vmul.f32 0.03125, %v496_v37 }
  0xec   : > { %866 = vmatpush.msra.mxu0 %v656_v0  ;;  %v1000_v0 = vld [vmem:[#allocation9 + $0x5c0] sm:$0xff] }
  0xed   : > { %v2155_v39 = vsub.f32 %v459_v17, %v500_v38  ;;  %v670_v17 = vld [vmem:[#allocation9 + $0x238] sm:$0xff] }
  0xee   : > { %810 = vmatpush.msrb.mxu1 %v670_v17  ;;  %867 = vmatpush.msra.mxu0 %v652_v3  ;;  %v680_v17 = vld [vmem:[#allocation9 + $0x288] sm:$0xff]  ;;  %v1003_v3 = vld [vmem:[#allocation9 + $0x5d8] sm:$0xff] }
  0xef   : > { %v504_v40 = vmul.f32 %v2155_v39, %v2155_v39 }
  0xf0   : > { %811 = vmatpush.msrb.mxu1 %v666_v20  ;;  %868 = vmatpush.msra.mxu0 %v648_v6  ;;  %v668_v20 = vld [vmem:[#allocation9 + $0x228] sm:$0xff]  ;;  %v998_v6 = vld [vmem:[#allocation9 + $0x5b0] sm:$0xff] }
  0xf1   : > { %524 = vmatmul.f32.gmra.mxu1 %v504_v40 }
  0xf2   : > { %888 = vmatpush.msra.mxu1 %v661_v63  ;;  %869 = vmatpush.msra.mxu0 %v644_v9  ;;  %v1007_v63 = vld [vmem:[#allocation9 + $0x5f8] sm:$0xff]  ;;  %v992_v9 = vld [vmem:[#allocation9 + $0x580] sm:$0xff] }
  0xf4   : > { %889 = vmatpush.msra.mxu1 %v657_v1  ;;  %870 = vmatpush.msra.mxu0 %v640_v12  ;;  %v1001_v1 = vld [vmem:[#allocation9 + $0x5c8] sm:$0xff]  ;;  %v995_v12 = vld [vmem:[#allocation9 + $0x598] sm:$0xff] }
  0xf6   : > { %890 = vmatpush.msra.mxu1 %v653_v4  ;;  %871 = vmatpush.msra.mxu0 %v636_v15  ;;  %v996_v4 = vld [vmem:[#allocation9 + $0x5a0] sm:$0xff]  ;;  %v989_v15 = vld [vmem:[#allocation9 + $0x568] sm:$0xff] }
  0xf8   : > { %891 = vmatpush.msra.mxu1 %v649_v7  ;;  %v999_v7 = vld [vmem:[#allocation9 + $0x5b8] sm:$0xff] }
  0xfa   : > { %892 = vmatpush.msra.mxu1 %v645_v10  ;;  %v993_v10 = vld [vmem:[#allocation9 + $0x588] sm:$0xff] }
  0xfc   : > { %893 = vmatpush.msra.mxu1 %v641_v13  ;;  %v913_v13 = vld [vmem:[#allocation8 + $0x28] sm:$0xff] }
  0xfe   : > { %894 = vmatpush.msra.mxu1 %v637_v16  ;;  %v990_v16 = vld [vmem:[#allocation9 + $0x570] sm:$0xff] }
 0x166   : > { %v522_v23 = vpop.f32.mrf.mxu1 }
 0x167   : > { %v528_v25 = vmul.f32 0.03125, %v522_v23  ;;  %v655_v23 = vld [vmem:[#allocation9 + $0x1c8] sm:$0xff] }
 0x169   : > { %v530_v27 = vadd.f32 1e-05, %v528_v25  ;;  %v647_v25 = vld [vmem:[#allocation9 + $0x188] sm:$0xff] }
 0x16b   : > { %1666 = vrsqrt.f32 %v530_v27  ;;  %vm538_vm1 = vweird.f32 %v530_v27 }
 0x16e   : > { %v525_v29 = vpop.f32.mrf.mxu1 }
 0x16f   : > { %v529_v30 = vmul.f32 0.03125, %v525_v29  ;;  %v631_v29 = vld [vmem:[#allocation9 + $0x108] sm:$0xff] }
 0x171   : > { %v1667_v31 = vpop.eup %1666  ;;  %v531_v32 = vadd.f32 1e-05, %v529_v30  ;;  %v632_v30 = vld [vmem:[#allocation9 + $0x110] sm:$0xff] }
 0x172   : > { %v533_v34 = vmul.f32 %v1667_v31, %v530_v27  ;;  %vm539_vm0 = vweird.f32 %v1667_v31  ;;  %v639_v27 = vld [vmem:[#allocation9 + $0x148] sm:$0xff]  ;;  %872 = vmatpush.msra.mxu0 %v632_v30  ;;  %v972_v30 = vld [vmem:[#allocation9 + $0x4e0] sm:$0xff] }
 0x173   : > { %1668 = vrsqrt.f32 %v531_v32  ;;  %vm540_vm2 = vmor %vm538_vm1, %vm539_vm0  ;;  %vm548_vm4 = vweird.f32 %v531_v32 }
 0x174   : > { %v534_v35 = vmul.f32 %v1667_v31, %v533_v34  ;;  %v628_v34 = vld [vmem:[#allocation9 + $0xf0] sm:$0xff] }
 0x175   : > { %873 = vmatpush.msra.mxu0 %v628_v34  ;;  %v975_v34 = vld [vmem:[#allocation9 + $0x4f8] sm:$0xff] }
 0x176   : > { %v535_v36 = vmul.f32 0.5, %v534_v35  ;;  %v629_v35 = vld [vmem:[#allocation9 + $0xf8] sm:$0xff] }
 0x178   : > { %v536_v37 = vsub.f32 1.5, %v535_v36  ;;  %v623_v36 = vld [vmem:[#allocation9 + $0xc8] sm:$0xff] }
 0x179   : > { %v1669_v38 = vpop.eup %1668 }
 0x17a   : > { %v537_v40 = vmul.f32 %v1667_v31, %v536_v37  ;;  %v543_v41 = vmul.f32 %v1669_v38, %v531_v32  ;;  %vm549_vm3 = vweird.f32 %v1669_v38  ;;  %v627_v32 = vld [vmem:[#allocation9 + $0xe8] sm:$0xff]  ;;  %v624_v37 = vld [vmem:[#allocation9 + $0xd0] sm:$0xff] }
 0x17b   : > { %vm550_vm5 = vmor %vm548_vm4, %vm549_vm3  ;;  %874 = vmatpush.msra.mxu0 %v624_v37  ;;  %v970_v37 = vld [vmem:[#allocation9 + $0x4d0] sm:$0xff] }
 0x17c   : > { %v541_v43 = vsel %vm540_vm2, %v1667_v31, %v537_v40  ;;  %v544_v44 = vmul.f32 %v1669_v38, %v543_v41  ;;  %v633_v31 = vld [vmem:[#allocation9 + $0x118] sm:$0xff]  ;;  %v619_v40 = vld [vmem:[#allocation9 + $0xa8] sm:$0xff]  ;;  %v620_v41 = vld [vmem:[#allocation9 + $0xb0] sm:$0xff] }
 0x17d   : > { %v552_v45 = vmul.f32 %v541_v43, %v2151_v33  ;;  %895 = vmatpush.msra.mxu1 %v633_v31  ;;  %875 = vmatpush.msra.mxu0 %v620_v41  ;;  %v615_v43 = vld [vmem:[#allocation9 + $0x88] sm:$0xff] }
 0x17e   : > { %v545_v47 = vmul.f32 0.5, %v544_v44  ;;  %v616_v44 = vld [vmem:[#allocation9 + $0x90] sm:$0xff]  ;;  %v973_v31 = vld [vmem:[#allocation9 + $0x4e8] sm:$0xff] }
 0x17f   : > { %v558_v48 = vmul.f32 %v1664_v42, %v552_v45  ;;  %896 = vmatpush.msra.mxu1 %v629_v35  ;;  %v617_v45 = vld [vmem:[#allocation9 + $0x98] sm:$0xff]  ;;  %876 = vmatpush.msra.mxu0 %v616_v44  ;;  %v968_v35 = vld [vmem:[#allocation9 + $0x4c0] sm:$0xff]  ;;  %v965_v41 = vld [vmem:[#allocation9 + $0x4a8] sm:$0xff] }
 0x180   : > { %v546_v49 = vsub.f32 1.5, %v545_v47  ;;  %v612_v47 = vld [vmem:[#allocation9 + $0x70] sm:$0xff]  ;;  %v960_v44 = vld [vmem:[#allocation9 + $0x480] sm:$0xff] }
 0x181   : > { %v2166_v50 = vadd.f32 %v1665_v46, %v558_v48  ;;  %v613_v48 = vld [vmem:[#allocation9 + $0x78] sm:$0xff]  ;;  %877 = vmatpush.msra.mxu0 %v612_v47 }
 0x182   : > { %v547_v51 = vmul.f32 %v1669_v38, %v546_v49  ;;  %v607_v49 = vld [vmem:[#allocation9 + $0x48] sm:$0xff]  ;;  %v963_v47 = vld [vmem:[#allocation9 + $0x498] sm:$0xff] }
 0x183   : > { %743 = vmatmul.f32.vlgmr.msra.gmra.mxu3 %v2166_v50  ;;  %789 = vmatmul.f32.vlgmr.msrb.gmra.mxu0 %v2166_v50 }
 0x184   : > { %v551_v52 = vsel %vm550_vm5, %v1669_v38, %v547_v51  ;;  %812 = vmatmul.f32.vlgmr.msrb.gmra.mxu1 %v2166_v50  ;;  %v625_v38 = vld [vmem:[#allocation9 + $0xd8] sm:$0xff]  ;;  %v608_v51 = vld [vmem:[#allocation9 + $0x50] sm:$0xff] }
 0x185   : > { %v553_v33 = vmul.f32 %v551_v52, %v2155_v39  ;;  %v720_v39 = vld [vmem:[#allocation9 + $0x3c8] sm:$0xff]  ;;  %897 = vmatpush.msra.mxu1 %v625_v38  ;;  %v609_v52 = vld [vmem:[#allocation9 + $0x58] sm:$0xff]  ;;  %878 = vmatpush.msra.mxu0 %v608_v51  ;;  %v958_v51 = vld [vmem:[#allocation9 + $0x470] sm:$0xff] }
 0x186   : > { %v971_v38 = vld [vmem:[#allocation9 + $0x4d8] sm:$0xff] }
 0x187   : > { %v559_v53 = vmul.f32 %v1664_v42, %v553_v33  ;;  %v621_v42 = vld [vmem:[#allocation9 + $0xb8] sm:$0xff]  ;;  %v603_v33 = vld [vmem:[#allocation9 + $0x28] sm:$0xff] }
 0x188   : > { %898 = vmatpush.msra.mxu1 %v621_v42  ;;  %v966_v42 = vld [vmem:[#allocation9 + $0x4b0] sm:$0xff] }
 0x189   : > { %v2172_v54 = vadd.f32 %v1665_v46, %v559_v53  ;;  %v611_v46 = vld [vmem:[#allocation9 + $0x68] sm:$0xff]  ;;  %v604_v53 = vld [vmem:[#allocation9 + $0x30] sm:$0xff] }
 0x18a   : > { %899 = vmatpush.msra.mxu1 %v617_v45  ;;  %879 = vmatpush.msra.mxu0 %v604_v53  ;;  %v961_v45 = vld [vmem:[#allocation9 + $0x488] sm:$0xff] }
 0x18b   : > { %589 = vmatpush.msra.mxu2 %v2172_v54  ;;  %746 = vmatmul.f32.gmra.mxu3 %v2172_v54  ;;  %v953_v53 = vld [vmem:[#allocation9 + $0x448] sm:$0xff] }
 0x18c   : > { %792 = vmatmul.f32.gmra.mxu0 %v2172_v54  ;;  %815 = vmatmul.f32.gmra.mxu1 %v2172_v54 }
 0x18d   : > { %934 = vmatpush.msra.mxu3 %v2172_v54  ;;  %590 = vmatpush.msra.mxu2 %v2166_v50 }
 0x18e   : > { %1535 = vmatmul.msk.f32.vlgmr.msra.gmra.mxu2 %vm568_vm6, %v566_v55  ;;  %900 = vmatpush.msra.mxu1 %v613_v48  ;;  %v605_v55 = vld [vmem:[#allocation9 + $0x38] sm:$0xff]  ;;  %v956_v48 = vld [vmem:[#allocation9 + $0x460] sm:$0xff] }
 0x18f   : > { %935 = vmatpush.msra.mxu3 %v2166_v50  ;;  %750 = vmatpush.msrb.mxu2 %v724_v56  ;;  %v599_v56 = vld [vmem:[#allocation9 + $0x8] sm:$0xff] }
 0x190   : > { %901 = vmatpush.msra.mxu1 %v609_v52  ;;  %v959_v52 = vld [vmem:[#allocation9 + $0x478] sm:$0xff] }
 0x191   : > { %751 = vmatpush.msrb.mxu2 %v720_v39  ;;  %v600_v39 = vld [vmem:[#allocation9 + $0x10] sm:$0xff] }
 0x192   : > { %902 = vmatpush.msra.mxu1 %v605_v55  ;;  %880 = vmatpush.msra.mxu0 %v600_v39  ;;  %v954_v55 = vld [vmem:[#allocation9 + $0x450] sm:$0xff]  ;;  %v948_v39 = vld [vmem:[#allocation9 + $0x420] sm:$0xff] }
 0x193   : > { %752 = vmatpush.msrb.mxu2 %v716_v57  ;;  %v601_v57 = vld [vmem:[#allocation9 + $0x18] sm:$0xff] }
 0x194   : > { %903 = vmatpush.msra.mxu1 %v601_v57  ;;  %1054 = vmatpush.msrb.mxu0 %v1006_v62  ;;  %v949_v57 = vld [vmem:[#allocation9 + $0x428] sm:$0xff] }
 0x195   : > { %753 = vmatpush.msrb.mxu2 %v712_v58  ;;  %v945_v62 = vld [vmem:[#allocation9 + $0x408] sm:$0xff] }
 0x196   : > { %1536 = vmatmul.msk.f32.gmra.mxu2 %vm568_vm6, %v567_v59  ;;  %1077 = vmatpush.msrb.mxu1 %v1007_v63  ;;  %v946_v63 = vld [vmem:[#allocation9 + $0x410] sm:$0xff] }
 0x197   : > { %754 = vmatpush.msrb.mxu2 %v708_v60  ;;  %v1004_v60 = vld [vmem:[#allocation9 + $0x5e0] sm:$0xff] }
 0x198   : > { %1078 = vmatpush.msrb.mxu1 %v1003_v3  ;;  %v1148_v3 = vld [vmem:[#allocation11 + $0x70] sm:$0xff] }
 0x199   : > { %755 = vmatpush.msrb.mxu2 %v704_v61  ;;  %v1005_v61 = vld [vmem:[#allocation9 + $0x5e8] sm:$0xff] }
 0x19a   : > { %1079 = vmatpush.msrb.mxu1 %v999_v7  ;;  %v2192_v7 = vld [vmem:[#allocation11 + $0x170] sm:$0xff] }
 0x19b   : > { %756 = vmatpush.msrb.mxu2 %v700_v2  ;;  %v1002_v2 = vld [vmem:[#allocation9 + $0x5d0] sm:$0xff] }
 0x19c   : > { %1055 = vmatpush.msrb.mxu0 %v1002_v2  ;;  %1080 = vmatpush.msrb.mxu1 %v995_v12  ;;  %v1149_v2 = vld [vmem:[#allocation11 + $0x78] sm:$0xff] }
 0x19d   : > { %757 = vmatpush.msrb.mxu2 %v696_v5  ;;  %v997_v5 = vld [vmem:[#allocation9 + $0x5a8] sm:$0xff]  ;;  %v1165_v12 = vld [vmem:[#allocation11 + $0xf8] sm:$0xff] }
 0x19e   : > { %1056 = vmatpush.msrb.mxu0 %v998_v6  ;;  %v1197_v6 = vld [vmem:[#allocation11 + $0x1f8] sm:$0xff] }
 0x19f   : > { %758 = vmatpush.msrb.mxu2 %v692_v8  ;;  %v912_v8 = vld [vmem:[#allocation8 + $0x20] sm:$0xff] }
 0x1a1   : > { %759 = vmatpush.msrb.mxu2 %v688_v11  ;;  %v994_v11 = vld [vmem:[#allocation9 + $0x590] sm:$0xff] }
 0x1a2   : > { %1057 = vmatpush.msrb.mxu0 %v994_v11  ;;  %v1195_v11 = vld [vmem:[#allocation11 + $0x1e8] sm:$0xff] }
 0x1a3   : > { %760 = vmatpush.msrb.mxu2 %v684_v14  ;;  %v988_v14 = vld [vmem:[#allocation9 + $0x560] sm:$0xff] }
 0x1a4   : > { %1058 = vmatpush.msrb.mxu0 %v990_v16  ;;  %v1194_v16 = vld [vmem:[#allocation11 + $0x1e0] sm:$0xff] }
 0x1a5   : > { %761 = vmatpush.msrb.mxu2 %v680_v17  ;;  %v991_v17 = vld [vmem:[#allocation9 + $0x578] sm:$0xff] }
 0x1a6   : > { %1081 = vmatpush.msrb.mxu1 %v991_v17  ;;  %v1164_v17 = vld [vmem:[#allocation11 + $0xf0] sm:$0xff] }
 0x1a7   : > { %762 = vmatpush.msrb.mxu2 %v676_v18  ;;  %v984_v18 = vld [vmem:[#allocation9 + $0x540] sm:$0xff] }
 0x1a9   : > { %763 = vmatpush.msrb.mxu2 %v672_v19  ;;  %v985_v19 = vld [vmem:[#allocation9 + $0x548] sm:$0xff] }
 0x1ab   : > { %764 = vmatpush.msrb.mxu2 %v668_v20  ;;  %v986_v20 = vld [vmem:[#allocation9 + $0x550] sm:$0xff] }
 0x1ac   : > { %1059 = vmatpush.msrb.mxu0 %v986_v20  ;;  %v1144_v20 = vld [vmem:[#allocation11 + $0x50] sm:$0xff] }
 0x1ad   : > { %765 = vmatpush.msrb.mxu2 %v664_v21  ;;  %v987_v21 = vld [vmem:[#allocation9 + $0x558] sm:$0xff] }
 0x1ae   : > { %766 = vmatmul.f32.vlgmr.msrb.gmra.mxu2 %v2166_v50  ;;  %1082 = vmatpush.msrb.mxu1 %v987_v21  ;;  %v1193_v21 = vld [vmem:[#allocation11 + $0x1d8] sm:$0xff] }
 0x1af   : > { %842 = vmatpush.msra.mxu2 %v659_v22  ;;  %v980_v22 = vld [vmem:[#allocation9 + $0x520] sm:$0xff] }
 0x1b1   : > { %843 = vmatpush.msra.mxu2 %v655_v23  ;;  %v981_v23 = vld [vmem:[#allocation9 + $0x528] sm:$0xff] }
 0x1b3   : > { %844 = vmatpush.msra.mxu2 %v651_v24  ;;  %v982_v24 = vld [vmem:[#allocation9 + $0x530] sm:$0xff] }
 0x1b4   : > { %1060 = vmatpush.msrb.mxu0 %v982_v24  ;;  %v1143_v24 = vld [vmem:[#allocation11 + $0x48] sm:$0xff] }
 0x1b5   : > { %845 = vmatpush.msra.mxu2 %v647_v25  ;;  %v983_v25 = vld [vmem:[#allocation9 + $0x538] sm:$0xff] }
 0x1b6   : > { %769 = vmatmul.f32.gmra.mxu2 %v2172_v54  ;;  %1083 = vmatpush.msrb.mxu1 %v983_v25  ;;  %v1192_v25 = vld [vmem:[#allocation11 + $0x1d0] sm:$0xff] }
 0x1b7   : > { %846 = vmatpush.msra.mxu2 %v643_v26  ;;  %v976_v26 = vld [vmem:[#allocation9 + $0x500] sm:$0xff] }
 0x1b9   : > { %847 = vmatpush.msra.mxu2 %v639_v27  ;;  %v977_v27 = vld [vmem:[#allocation9 + $0x508] sm:$0xff] }
 0x1bb   : > { %848 = vmatpush.msra.mxu2 %v635_v28  ;;  %v978_v28 = vld [vmem:[#allocation9 + $0x510] sm:$0xff] }
 0x1bc   : > { %1061 = vmatpush.msrb.mxu0 %v978_v28  ;;  %v1142_v28 = vld [vmem:[#allocation11 + $0x40] sm:$0xff] }
 0x1bd   : > { %849 = vmatpush.msra.mxu2 %v631_v29  ;;  %v979_v29 = vld [vmem:[#allocation9 + $0x518] sm:$0xff] }
 0x1be   : > { %1084 = vmatpush.msrb.mxu1 %v979_v29  ;;  %v1191_v29 = vld [vmem:[#allocation11 + $0x1c8] sm:$0xff] }
 0x1bf   : > { %850 = vmatpush.msra.mxu2 %v627_v32  ;;  %v974_v32 = vld [vmem:[#allocation9 + $0x4f0] sm:$0xff] }
 0x1c0   : > { %1062 = vmatpush.msrb.mxu0 %v974_v32  ;;  %1085 = vmatpush.msrb.mxu1 %v975_v34  ;;  %v1141_v34 = vld [vmem:[#allocation11 + $0x38] sm:$0xff] }
 0x1c1   : > { %851 = vmatpush.msra.mxu2 %v623_v36  ;;  %v969_v36 = vld [vmem:[#allocation9 + $0x4c8] sm:$0xff] }
 0x1c2   : > { %1063 = vmatpush.msrb.mxu0 %v970_v37  ;;  %1086 = vmatpush.msrb.mxu1 %v971_v38  ;;  %v1173_v37 = vld [vmem:[#allocation11 + $0x138] sm:$0xff]  ;;  %v1159_v38 = vld [vmem:[#allocation11 + $0xc8] sm:$0xff] }
 0x1c3   : > { %852 = vmatpush.msra.mxu2 %v619_v40  ;;  %v964_v40 = vld [vmem:[#allocation9 + $0x4a0] sm:$0xff] }
 0x1c4   : > { %1064 = vmatpush.msrb.mxu0 %v966_v42  ;;  %v1172_v42 = vld [vmem:[#allocation11 + $0x130] sm:$0xff] }
 0x1c5   : > { %853 = vmatpush.msra.mxu2 %v615_v43  ;;  %v967_v43 = vld [vmem:[#allocation9 + $0x4b8] sm:$0xff] }
 0x1c6   : > { %1087 = vmatpush.msrb.mxu1 %v967_v43  ;;  %v1158_v43 = vld [vmem:[#allocation11 + $0xc0] sm:$0xff] }
 0x1c7   : > { %854 = vmatpush.msra.mxu2 %v611_v46  ;;  %v962_v46 = vld [vmem:[#allocation9 + $0x490] sm:$0xff] }
 0x1c8   : > { %1065 = vmatpush.msrb.mxu0 %v962_v46  ;;  %1088 = vmatpush.msrb.mxu1 %v963_v47  ;;  %v1171_v46 = vld [vmem:[#allocation11 + $0x128] sm:$0xff]  ;;  %v1157_v47 = vld [vmem:[#allocation11 + $0xb8] sm:$0xff] }
 0x1c9   : > { %855 = vmatpush.msra.mxu2 %v607_v49  ;;  %v957_v49 = vld [vmem:[#allocation9 + $0x468] sm:$0xff] }
 0x1ca   : > { %1066 = vmatpush.msrb.mxu0 %v958_v51  ;;  %1089 = vmatpush.msrb.mxu1 %v959_v52  ;;  %v1187_v51 = vld [vmem:[#allocation11 + $0x1a8] sm:$0xff]  ;;  %v1170_v52 = vld [vmem:[#allocation11 + $0x120] sm:$0xff] }
 0x1cb   : > { %856 = vmatpush.msra.mxu2 %v603_v33  ;;  %v952_v33 = vld [vmem:[#allocation9 + $0x440] sm:$0xff] }
 0x1cc   : > { %1067 = vmatpush.msrb.mxu0 %v954_v55  ;;  %v1136_v55 = vld [vmem:[#allocation11 + $0x10] sm:$0xff] }
 0x1cd   : > { %857 = vmatpush.msra.mxu2 %v599_v56  ;;  %v955_v56 = vld [vmem:[#allocation9 + $0x458] sm:$0xff] }
 0x1ce   : > { %1090 = vmatpush.msrb.mxu1 %v955_v56 }
 0x1cf   : > { %1008 = vmatpush.msrb.mxu2 %v1004_v60  ;;  %v951_v60 = vld [vmem:[#allocation9 + $0x438] sm:$0xff] }
 0x1d0   : > { %1091 = vmatpush.msrb.mxu1 %v951_v60 }
 0x1d1   : > { %1009 = vmatpush.msrb.mxu2 %v1000_v0  ;;  %v947_v0 = vld [vmem:[#allocation9 + $0x418] sm:$0xff] }
 0x1d2   : > { %1092 = vmatpush.msrb.mxu1 %v947_v0 }
 0x1d3   : > { %1010 = vmatpush.msrb.mxu2 %v996_v4  ;;  %v2189_v4 = vld [vmem:[#allocation11 + $0x178] sm:$0xff] }
 0x1d5   : > { %1011 = vmatpush.msrb.mxu2 %v992_v9  ;;  %v2194_v9 = vld [vmem:[#allocation11 + $0x168] sm:$0xff] }
 0x1d7   : > { %1012 = vmatpush.msrb.mxu2 %v988_v14 }
 0x1d9   : > { %1013 = vmatpush.msrb.mxu2 %v984_v18  ;;  %v2202_v18 = vld [vmem:[#allocation11 + $0x158] sm:$0xff] }
 0x1db   : > { %1014 = vmatpush.msrb.mxu2 %v980_v22  ;;  %v2205_v22 = vld [vmem:[#allocation11 + $0x150] sm:$0xff] }
 0x1dd   : > { %1015 = vmatpush.msrb.mxu2 %v976_v26  ;;  %v2208_v26 = vld [vmem:[#allocation11 + $0x148] sm:$0xff] }
 0x1df   : > { %1016 = vmatpush.msrb.mxu2 %v972_v30  ;;  %v2211_v30 = vld [vmem:[#allocation11 + $0x140] sm:$0xff] }
 0x1e1   : > { %1017 = vmatpush.msrb.mxu2 %v968_v35  ;;  %v1190_v35 = vld [vmem:[#allocation11 + $0x1c0] sm:$0xff] }
 0x1e3   : > { %1018 = vmatpush.msrb.mxu2 %v964_v40  ;;  %v1140_v40 = vld [vmem:[#allocation11 + $0x30] sm:$0xff] }
 0x1e5   : > { %1019 = vmatpush.msrb.mxu2 %v960_v44  ;;  %v1139_v44 = vld [vmem:[#allocation11 + $0x28] sm:$0xff] }
 0x1e7   : > { %1020 = vmatpush.msrb.mxu2 %v956_v48 }
 0x1e9   : > { %1021 = vmatpush.msrb.mxu2 %v952_v33  ;;  %v1137_v33 = vld [vmem:[#allocation11 + $0x18] sm:$0xff] }
 0x1eb   : > { %1022 = vmatpush.msrb.mxu2 %v948_v39  ;;  %v1135_v39 = vld [vmem:[#allocation11 + $0x8] sm:$0xff] }
 0x201   : > { %v813_v60 = vpop.f32.mrf.mxu1 }
 0x211   : > { %v592_v58 = vpop.f32.mrf.mxu2 }
 0x212   : > { %835 = vmatmul.f32.vlgmr.msrb.gmra.mxu3 %v592_v58  ;;  %858 = vmatmul.f32.vlgmr.msra.gmra.mxu2 %v592_v58 }
 0x213   : > { %881 = vmatmul.f32.vlgmr.msra.gmra.mxu0 %v592_v58  ;;  %904 = vmatmul.f32.vlgmr.msra.gmra.mxu1 %v592_v58  ;;  %v2187_v58 = vpop.f32.mrf.mxu3 }
 0x214   : > { %1031 = vmatpush.msrb.mxu3 %v1005_v61  ;;  %v944_v61 = vld [vmem:[#allocation9 + $0x400] sm:$0xff]  ;;  %1269 = vmatpush.msra.mxu1 %v1197_v6  ;;  %v1183_v6 = vld [vmem:[#allocation11 + $0x188] sm:$0xff] }
 0x215   : > { %1023 = vmatpush.msrb.mxu2 %v944_v61  ;;  %v1156_v61 = vld [vmem:[#allocation11 + $0xb0] sm:$0xff] }
 0x216   : > { %1032 = vmatpush.msrb.mxu3 %v1001_v1 }
 0x217   : > { %1200 = vmatpush.msra.mxu2 %v1149_v2  ;;  %v1168_v2 = vld [vmem:[#allocation11 + $0x110] sm:$0xff] }
 0x218   : > { %1033 = vmatpush.msrb.mxu3 %v997_v5  ;;  %v1147_v5 = vld [vmem:[#allocation11 + $0x68] sm:$0xff] }
 0x219   : > { %v595_v59 = vpop.f32.mrf.mxu2  ;;  %1201 = vmatpush.msra.mxu2 %v1148_v3  ;;  %v1184_v3 = vld [vmem:[#allocation11 + $0x190] sm:$0xff] }
 0x21a   : > { %838 = vmatmul.f32.gmra.mxu3 %v595_v59  ;;  %861 = vmatmul.f32.gmra.mxu2 %v595_v59 }
 0x21b   : > { %884 = vmatmul.f32.gmra.mxu0 %v595_v59  ;;  %907 = vmatmul.f32.gmra.mxu1 %v595_v59  ;;  %v950_v59 = vld [vmem:[#allocation9 + $0x430] sm:$0xff]  ;;  %v747_v1 = vpop.f32.mrf.mxu3 }
 0x21c   : > { %1034 = vmatpush.msrb.mxu3 %v993_v10  ;;  %1068 = vmatpush.msrb.mxu0 %v950_v59  ;;  %v1146_v10 = vld [vmem:[#allocation11 + $0x60] sm:$0xff]  ;;  %v790_v59 = vpop.f32.mrf.mxu0 }
 0x21d   : > { %1202 = vmatpush.msra.mxu2 %v1147_v5  ;;  %v1167_v5 = vld [vmem:[#allocation11 + $0x108] sm:$0xff] }
 0x21e   : > { %1035 = vmatpush.msrb.mxu3 %v989_v15  ;;  %1069 = vmatpush.msrb.mxu0 %v946_v63  ;;  %v1145_v15 = vld [vmem:[#allocation11 + $0x58] sm:$0xff] }
 0x21f   : > { %1203 = vmatpush.msra.mxu2 %v1146_v10  ;;  %v1185_v63 = vld [vmem:[#allocation11 + $0x198] sm:$0xff]  ;;  %v1166_v10 = vld [vmem:[#allocation11 + $0x100] sm:$0xff] }
 0x220   : > { %1036 = vmatpush.msrb.mxu3 %v985_v19  ;;  %1246 = vmatpush.msra.mxu0 %v2189_v4  ;;  %v1163_v19 = vld [vmem:[#allocation11 + $0xe8] sm:$0xff] }
 0x221   : > { %1204 = vmatpush.msra.mxu2 %v1145_v15 }
 0x222   : > { %1537 = vmatmul.msk.f32.vlgmr.msra.gmra.mxu3 %vm568_vm6, %v912_v8  ;;  %v1196_v8 = vld [vmem:[#allocation11 + $0x1f0] sm:$0xff]  ;;  %1247 = vmatpush.msra.mxu0 %v2192_v7 }
 0x223   : > { %1037 = vmatpush.msrb.mxu3 %v981_v23  ;;  %1270 = vmatpush.msra.mxu1 %v1196_v8  ;;  %v1162_v23 = vld [vmem:[#allocation11 + $0xe0] sm:$0xff]  ;;  %v816_v8 = vpop.f32.mrf.mxu1 }
 0x224   : > { %1248 = vmatpush.msra.mxu0 %v2194_v9  ;;  %1205 = vmatpush.msra.mxu2 %v1144_v20 }
 0x225   : > { %1038 = vmatpush.msrb.mxu3 %v977_v27  ;;  %1271 = vmatpush.msra.mxu1 %v1195_v11  ;;  %v1161_v27 = vld [vmem:[#allocation11 + $0xd8] sm:$0xff]  ;;  %v1182_v11 = vld [vmem:[#allocation11 + $0x180] sm:$0xff] }
 0x226   : > { %1206 = vmatpush.msra.mxu2 %v1143_v24 }
 0x227   : > { %1039 = vmatpush.msrb.mxu3 %v973_v31  ;;  %1272 = vmatpush.msra.mxu1 %v1194_v16  ;;  %v1160_v31 = vld [vmem:[#allocation11 + $0xd0] sm:$0xff]  ;;  %v1150_v16 = vld [vmem:[#allocation11 + $0x80] sm:$0xff] }
 0x228   : > { %1207 = vmatpush.msra.mxu2 %v1142_v28 }
 0x229   : > { %1040 = vmatpush.msrb.mxu3 %v969_v36  ;;  %1273 = vmatpush.msra.mxu1 %v1193_v21 }
 0x22a   : > { %1538 = vmatmul.msk.f32.gmra.mxu3 %vm568_vm6, %v913_v13  ;;  %v2197_v13 = vld [vmem:[#allocation11 + $0x160] sm:$0xff]  ;;  %1208 = vmatpush.msra.mxu2 %v1141_v34 }
 0x22b   : > { %1041 = vmatpush.msrb.mxu3 %v965_v41  ;;  %1249 = vmatpush.msra.mxu0 %v2197_v13  ;;  %v1189_v41 = vld [vmem:[#allocation11 + $0x1b8] sm:$0xff] }
 0x22c   : > { %1274 = vmatpush.msra.mxu1 %v1192_v25  ;;  %1209 = vmatpush.msra.mxu2 %v1140_v40 }
 0x22d   : > { %1042 = vmatpush.msrb.mxu3 %v961_v45  ;;  %1250 = vmatpush.msra.mxu0 %v2202_v18  ;;  %v1188_v45 = vld [vmem:[#allocation11 + $0x1b0] sm:$0xff] }
 0x22e   : > { %1275 = vmatpush.msra.mxu1 %v1191_v29  ;;  %1210 = vmatpush.msra.mxu2 %v1139_v44 }
 0x22f   : > { %1043 = vmatpush.msrb.mxu3 %v957_v49  ;;  %1251 = vmatpush.msra.mxu0 %v2205_v22  ;;  %v1138_v49 = vld [vmem:[#allocation11 + $0x20] sm:$0xff] }
 0x230   : > { %1276 = vmatpush.msra.mxu1 %v1190_v35  ;;  %1211 = vmatpush.msra.mxu2 %v1138_v49 }
 0x231   : > { %1044 = vmatpush.msrb.mxu3 %v953_v53  ;;  %1252 = vmatpush.msra.mxu0 %v2208_v26  ;;  %v1186_v53 = vld [vmem:[#allocation11 + $0x1a0] sm:$0xff]  ;;  %v767_v0 = vpop.f32.mrf.mxu2 }
 0x232   : > { %1277 = vmatpush.msra.mxu1 %v1189_v41  ;;  %1212 = vmatpush.msra.mxu2 %v1137_v33 }
 0x233   : > { %1045 = vmatpush.msrb.mxu3 %v949_v57  ;;  %1253 = vmatpush.msra.mxu0 %v2211_v30  ;;  %v1134_v57 = vld [vmem:[#allocation11] sm:$0xff] }
 0x234   : > { %1278 = vmatpush.msra.mxu1 %v1188_v45  ;;  %1213 = vmatpush.msra.mxu2 %v1136_v55 }
 0x235   : > { %1046 = vmatpush.msrb.mxu3 %v945_v62  ;;  %1254 = vmatpush.msra.mxu0 %v1173_v37  ;;  %v1169_v62 = vld [vmem:[#allocation11 + $0x118] sm:$0xff] }
 0x236   : > { %1279 = vmatpush.msra.mxu1 %v1187_v51  ;;  %1214 = vmatpush.msra.mxu2 %v1135_v39 }
 0x237   : > { %1223 = vmatpush.msra.mxu3 %v1165_v12  ;;  %1255 = vmatpush.msra.mxu0 %v1172_v42  ;;  %v1152_v12 = vld [vmem:[#allocation11 + $0x90] sm:$0xff] }
 0x238   : > { %1280 = vmatpush.msra.mxu1 %v1186_v53  ;;  %1215 = vmatpush.msra.mxu2 %v1134_v57 }
 0x239   : > { %1224 = vmatpush.msra.mxu3 %v1164_v17  ;;  %1256 = vmatpush.msra.mxu0 %v1171_v46  ;;  %v770_v15 = vpop.f32.mrf.mxu2 }
 0x23a   : > { %1281 = vmatpush.msra.mxu1 %v1185_v63 }
 0x23b   : > { %1225 = vmatpush.msra.mxu3 %v1163_v19  ;;  %1257 = vmatpush.msra.mxu0 %v1170_v52 }
 0x23c   : > { %1282 = vmatpush.msra.mxu1 %v1184_v3 }
 0x23d   : > { %1226 = vmatpush.msra.mxu3 %v1162_v23  ;;  %1258 = vmatpush.msra.mxu0 %v1169_v62 }
 0x23e   : > { %1283 = vmatpush.msra.mxu1 %v1183_v6  ;;  %v1199_v6 = vstv %s1198_s29 }
 0x23f   : > { %1227 = vmatpush.msra.mxu3 %v1161_v27  ;;  %1259 = vmatpush.msra.mxu0 %v1168_v2 }
 0x240   : > { %1284 = vmatpush.msra.mxu1 %v1182_v11 }
 0x241   : > { %1228 = vmatpush.msra.mxu3 %v1160_v31  ;;  %1260 = vmatpush.msra.mxu0 %v1167_v5 }
 0x243   : > { %1229 = vmatpush.msra.mxu3 %v1159_v38  ;;  %1261 = vmatpush.msra.mxu0 %v1166_v10 }
 0x245   : > { %1230 = vmatpush.msra.mxu3 %v1158_v43 }
 0x247   : > { %1231 = vmatpush.msra.mxu3 %v1157_v47 }
 0x249   : > { %1232 = vmatpush.msra.mxu3 %v1156_v61 }
 0x295   : > { %v2199_v14 = vpop.f32.mrf.mxu3  ;;  %v859_v19 = vpop.f32.mrf.mxu2 }
 0x296   : > { %v837_v35 = vadd.f32 %v2199_v14, %v2187_v58 }
 0x29d   : > { %v839_v32 = vpop.f32.mrf.mxu3  ;;  %v862_v23 = vpop.f32.mrf.mxu2 }
 0x29e   : > { %v2214_v36 = vadd.f32 %v839_v32, %v747_v1  ;;  %v1155_v1 = vld [vmem:[#allocation11 + $0xa8] sm:$0xff]  ;;  %v863_v58 = vadd.f32 %v862_v23, %v770_v15 }
 0x29f   : > { %1233 = vmatpush.msra.mxu3 %v1155_v1 }
 0x2a5   : > { %v937_v48 = vpop.f32.mrf.mxu3 }
 0x2a6   : > { %1024 = vmatmul.f32.vlgmr.msrb.gmra.mxu2 %v937_v48  ;;  %1047 = vmatmul.f32.vlgmr.msrb.gmra.mxu3 %v937_v48 }
 0x2a7   : > { %1070 = vmatmul.f32.vlgmr.msrb.gmra.mxu0 %v937_v48  ;;  %1093 = vmatmul.f32.vlgmr.msrb.gmra.mxu1 %v937_v48 }
 0x2a8   : > { %1550 = vmatpush.msrb.mxu2 %v2189_v4  ;;  %v1154_v4 = vld [vmem:[#allocation11 + $0xa0] sm:$0xff] }
 0x2a9   : > { %1234 = vmatpush.msra.mxu3 %v1154_v4 }
 0x2aa   : > { %1551 = vmatpush.msrb.mxu2 %v2192_v7  ;;  %v2225_v7 = vpop.f32.mrf.mxu0 }
 0x2ac   : > { %1552 = vmatpush.msrb.mxu2 %v2194_v9  ;;  %v1153_v9 = vld [vmem:[#allocation11 + $0x98] sm:$0xff] }
 0x2ad   : > { %v940_v56 = vpop.f32.mrf.mxu3  ;;  %1235 = vmatpush.msra.mxu3 %v1153_v9 }
 0x2ae   : > { %1027 = vmatmul.f32.gmra.mxu2 %v940_v56  ;;  %1050 = vmatmul.f32.gmra.mxu3 %v940_v56 }
 0x2af   : > { %1073 = vmatmul.f32.gmra.mxu0 %v940_v56  ;;  %1096 = vmatmul.f32.gmra.mxu1 %v940_v56 }
 0x2b0   : > { %1553 = vmatpush.msrb.mxu2 %v2197_v13  ;;  %1236 = vmatpush.msra.mxu3 %v1152_v12  ;;  %v1151_v13 = vld [vmem:[#allocation11 + $0x88] sm:$0xff] }
 0x2b2   : > { %1554 = vmatpush.msrb.mxu2 %v2202_v18  ;;  %1237 = vmatpush.msra.mxu3 %v1151_v13  ;;  %v882_v17 = vpop.f32.mrf.mxu0  ;;  %v905_v18 = vpop.f32.mrf.mxu1 }
 0x2b3   : > { %v883_v24 = vadd.f32 %v882_v17, %v790_v59  ;;  %v906_v25 = vadd.f32 %v905_v18, %v813_v60 }
 0x2b4   : > { %1555 = vmatpush.msrb.mxu2 %v2205_v22  ;;  %1238 = vmatpush.msra.mxu3 %v1150_v16  ;;  %v1108_v22 = vld [vmem:[%s2302_s7] sm:$0xf] }
 0x2b5   : > { %v1113_v27 = vperm.slane %v1108_v22, 3  ;;  %v1110_v38 = vperm.slane %v1108_v22, 0  ;;  %v1111_v40 = vperm.slane %v1108_v22, 1 }
 0x2b6   : > { %1556 = vmatpush.msrb.mxu2 %v2208_v26  ;;  %v1112_v26 = vperm.slane %v1108_v22, 2 }
 0x2b8   : > { %1557 = vmatpush.msrb.mxu2 %v2211_v30 }
 0x2ba   : > { %1558 = vmatpush.msrb.mxu2 %v1173_v37  ;;  %v885_v20 = vpop.f32.mrf.mxu0  ;;  %v908_v21 = vpop.f32.mrf.mxu1  ;;  %v860_v37 = vadd.f32 %v859_v19, %v767_v0 }
 0x2bb   : > { %v909_v47 = vadd.f32 %v908_v21, %v816_v8  ;;  %v886_v61 = vadd.f32 %v885_v20, %v2225_v7 }
 0x2bc   : > { %1559 = vmatpush.msrb.mxu2 %v1172_v42 }
 0x2be   : > { %1560 = vmatpush.msrb.mxu2 %v1171_v46 }
 0x2c0   : > { %1561 = vmatpush.msrb.mxu2 %v1170_v52 }
 0x2c2   : > { %1562 = vmatpush.msrb.mxu2 %v1169_v62 }
 0x2c4   : > { %1563 = vmatpush.msrb.mxu2 %v1168_v2 }
 0x2c6   : > { %1564 = vmatpush.msrb.mxu2 %v1167_v5 }
 0x2c8   : > { %1565 = vmatpush.msrb.mxu2 %v1166_v10 }
 0x324   : > { %v1071_v28 = vpop.f32.mrf.mxu0  ;;  %v1094_v29 = vpop.f32.mrf.mxu1 }
 0x325   : > { %v1102_v30 = vadd.f32 %v1071_v28, %v883_v24  ;;  %v1103_v31 = vadd.f32 %v1094_v29, %v906_v25 }
 0x327   : > { %v1120_v32 = vadd.f32 %v1112_v26, %v1102_v30  ;;  %v1121_v34 = vadd.f32 %v1113_v27, %v1103_v31 }
 0x329   : > { %v1128_v41 = vmax.f32 %v1120_v32, 0.0  ;;  %v1129_v42 = vmax.f32 %v1121_v34, 0.0  ;;  %v1025_v43 = vpop.f32.mrf.mxu2  ;;  %v1048_v44 = vpop.f32.mrf.mxu3 }
 0x32a   : > { %v1100_v45 = vadd.f32 %v1025_v43, %v837_v35  ;;  %v1101_v46 = vadd.f32 %v1048_v44, %v860_v37 }
 0x32b   : > { %1262 = vmatmul.f32.vlgmr.msra.gmra.mxu0 %v1128_v41  ;;  %1285 = vmatmul.f32.vlgmr.msra.gmra.mxu1 %v1129_v42 }
 0x32c   : > { %v1118_v48 = vadd.f32 %v1110_v38, %v1100_v45  ;;  %v1119_v49 = vadd.f32 %v1111_v40, %v1101_v46  ;;  %v1097_v51 = vpop.f32.mrf.mxu1  ;;  %v1074_v60 = vpop.f32.mrf.mxu0 }
 0x32d   : > { %v1107_v52 = vadd.f32 %v1097_v51, %v909_v47  ;;  %v1106_v0 = vadd.f32 %v1074_v60, %v886_v61 }
 0x32e   : > { %v1126_v33 = vmax.f32 %v1118_v48, 0.0  ;;  %v1127_v53 = vmax.f32 %v1119_v49, 0.0 }
 0x32f   : > { %v1125_v55 = vadd.f32 %v1113_v27, %v1107_v52  ;;  %v1124_v3 = vadd.f32 %v1112_v26, %v1106_v0 }
 0x330   : > { %1216 = vmatmul.f32.vlgmr.msra.gmra.mxu2 %v1126_v33  ;;  %1239 = vmatmul.f32.vlgmr.msra.gmra.mxu3 %v1127_v53 }
 0x331   : > { %v1028_v14 = vpop.f32.mrf.mxu2  ;;  %v1051_v56 = vpop.f32.mrf.mxu3  ;;  %v1133_v39 = vmax.f32 %v1125_v55, 0.0  ;;  %v1132_v4 = vmax.f32 %v1124_v3, 0.0 }
 0x332   : > { %v1104_v57 = vadd.f32 %v1028_v14, %v2214_v36  ;;  %v1105_v59 = vadd.f32 %v1051_v56, %v863_v58 }
 0x333   : > { %1288 = vmatmul.f32.gmra.mxu1 %v1133_v39 }
 0x334   : > { %v1122_v62 = vadd.f32 %v1110_v38, %v1104_v57  ;;  %v1123_v63 = vadd.f32 %v1111_v40, %v1105_v59 }
 0x336   : > { %v1130_v1 = vmax.f32 %v1122_v62, 0.0  ;;  %v1131_v2 = vmax.f32 %v1123_v63, 0.0 }
 0x338   : > { %1219 = vmatmul.f32.gmra.mxu2 %v1130_v1  ;;  %1242 = vmatmul.f32.gmra.mxu3 %v1131_v2 }
 0x340   : > { %1265 = vmatmul.f32.vlgmr.msrb.gmra.mxu2 %v1132_v4 }
 0x3a8   : > { %v1286_v9 = vpop.f32.mrf.mxu1  ;;  %v1263_v7 = vpop.f32.mrf.mxu0 }
 0x3b0   : > { %v1289_v19 = vpop.f32.mrf.mxu1 }
 0x3b3   : > { %v1217_v5 = vpop.f32.mrf.mxu2  ;;  %v1240_v8 = vpop.f32.mrf.mxu3 }
 0x3b4   : > { %v1218_v36 = vadd.f32 %v1217_v5, %v1199_v6 }
 0x3b6   : > { %v1241_v11 = vadd.f32 %v1240_v8, %v1218_v36 }
 0x3b8   : > { %v1264_v15 = vadd.f32 %v1263_v7, %v1241_v11 }
 0x3ba   : > { %v1287_v20 = vadd.f32 %v1286_v9, %v1264_v15 }
 0x3bb   : > { %v1220_v10 = vpop.f32.mrf.mxu2  ;;  %v1243_v13 = vpop.f32.mrf.mxu3 }
 0x3bc   : > { %v1221_v12 = vadd.f32 %v1220_v10, %v1199_v6 }
 0x3be   : > { %v1244_v16 = vadd.f32 %v1243_v13, %v1221_v12 }
 0x3c3   : > { %v1266_v17 = vpop.f32.mrf.mxu2 }
 0x3c4   : > { %v1267_v18 = vadd.f32 %v1266_v17, %v1244_v16 }
 0x3c6   : > { %v1290_v21 = vadd.f32 %v1289_v19, %v1267_v18 }
 0x3c8   : > { %v1292_v22 = vmax.f32 %v1287_v20, %v1290_v21 }
 0x3ca   : > { %v1293_v23 = vrot.slane %v1292_v22, 4 }
 0x3cc   : > { %v1294_v24 = vmax.f32 %v1292_v22, %v1293_v23 }
 0x3ce   : > { %v1295_v25 = vrot.slane %v1294_v24, 2 }
 0x3d0   : > { %v1296_v26 = vmax.f32 %v1294_v24, %v1295_v25 }
 0x3d2   : > { %v1297_v27 = vrot.slane %v1296_v26, 1 }
 0x3d4   : > { %v1298_v28 = vmax.f32 %v1296_v26, %v1297_v27 }
 0x3d6   : > { %v1299_v29 = vsub.f32 %v1287_v20, %v1298_v28  ;;  %v1300_v30 = vsub.f32 %v1290_v21, %v1298_v28 }
 0x3d8   : > { %v1301_v31 = vmul.f32 1.442695, %v1299_v29  ;;  %v1303_v32 = vmul.f32 1.442695, %v1300_v30 }
 0x3da   : > { %1670 = vpow2.f32 %v1301_v31 }
 0x3db   : > { %1672 = vpow2.f32 %v1303_v32 }
 0x3e0   : > { %v1671_v34 = vpop.eup %1670 }
 0x3e1   : > { %v1673_v35 = vpop.eup %1672 }
 0x3e2   : > { %v1305_v37 = vadd.f32 %v1673_v35, %v1671_v34 }
 0x3e4   : > { %v1306_v38 = vrot.slane %v1305_v37, 4 }
 0x3e6   : > { %v1307_v40 = vadd.f32 %v1306_v38, %v1305_v37 }
 0x3e8   : > { %v1308_v41 = vrot.slane %v1307_v40, 2 }
 0x3ea   : > { %v1309_v42 = vadd.f32 %v1308_v41, %v1307_v40 }
 0x3ec   : > { %v1310_v43 = vrot.slane %v1309_v42, 1 }
 0x3ee   : > { %v1311_v44 = vadd.f32 %v1310_v43, %v1309_v42 }
 0x3f0   : > { %1674 = vrcp.f32 %v1311_v44  ;;  %v1323_v48 = vand.u32 2147483648, %v1311_v44  ;;  %v1321_v51 = vand.u32 2147483647, %v1311_v44  ;;  %vm1317_vm8 = vweird.f32 %v1311_v44 }
 0x3f2   : > { %v1324_v33 = vor.u32 1.1754944e-38, %v1323_v48  ;;  %vm1322_vm10 = vcmp.eq.f32.partialorder %v1321_v51, 8.507059e+37 }
 0x3f6   : > { %v1675_v45 = vpop.eup %1674 }
 0x3f7   : > { %v1313_v46 = vmul.f32 %v1675_v45, %v1311_v44  ;;  %vm1318_vm7 = vweird.f32 %v1675_v45 }
 0x3f8   : > { %vm1319_vm9 = vmor %vm1317_vm8, %vm1318_vm7 }
 0x3f9   : > { %v1314_v47 = vsub.f32 1.0, %v1313_v46 }
 0x3fb   : > { %v1315_v49 = vmul.f32 %v1675_v45, %v1314_v47 }
 0x3fd   : > { %v1316_v52 = vadd.f32 %v1675_v45, %v1315_v49 }
 0x3ff   : > { %v1320_v53 = vsel %vm1319_vm9, %v1675_v45, %v1316_v52 }
 0x400   : > { %v1325_v55 = vsel %vm1322_vm10, %v1324_v33, %v1320_v53 }
 0x401   : > { %v1327_v58 = vmul.f32 %v1671_v34, %v1325_v55  ;;  %v1328_v14 = vmul.f32 %v1673_v35, %v1325_v55 }
 0x403   : > { %v1331_v56 = vmul.f32 %v1327_v58, %v2166_v50  ;;  %v1332_v39 = vmul.f32 %v1328_v14, %v2172_v54  ;;  %1329 = vst [vmem:[%s457_s5] sm:$0xff] %v1327_v58 }
 0x404   : > { %1330 = vst [vmem:[%s457_s5 + $0x8] sm:$0xff] %v1328_v14 }
 0x405   : > { %1333 = vst [vmem:[%s450_s14] sm:$0xff] %v1331_v56 }
 0x406   : > { %1334 = vst [vmem:[%s450_s14 + $0x8] sm:$0xff] %v1332_v39 }
 0x407   : > { %1853 = shalt.err (!%p1850_p10)
}
 0x408   : > { %s1942_s14 = smov 128   ;;  %s1943_s24 = smov 8  }
 0x409   : > { %1584 = dma.vmem_to_hbm [thread:$0]  (%p2095_p3), %s2242_s22, 256, %s1356_s4, %s1336_s11, %s1942_s14, %s1942_s14, %s1943_s24  }
 0x40a   : > { %s1341_s23 = scalar_lea.sflag [#allocation14], %s2128_s28  ;;  %s1868_s8 = sshra.s32 %s2249_s25, 4  ;;  %s1869_s8 = int_to_ptr.hbm [resolvable:$true] %s1868_s8 }
 0x40b   : > { %s1870_s5 = scalar_lea.hbm %s1869_s8, 16  ;;  %s1874_s29 = scalar_lea.hbm %s2305_s10, 32 }
 0x40c   : > { %p1871_p12 = scmp.ne.s32.totalorder %s1869_s8, %s1870_s5  ;;  %p1875_p5 = scmp.lt.s32.totalorder %s1869_s8, %s2305_s10 }
 0x40d   : > { %p1876_p7 = scmp.lt.s32.totalorder %s1874_s29, %s1870_s5 }
 0x40e   : > { %p1872_p13 = pnand %p1871_p12, %p2095_p3 }
 0x40f   : > { %p1877_p1 = por %p1876_p7, %p1875_p5 }
 0x410   : > { %p1873_p0 = pneg %p1872_p13 }
 0x412   : > { %p1878_p4 = pnand %p1877_p1, %p1873_p0 }
 0x414   : > { %1881 = shalt.err (!%p1878_p4)
}
 0x415   : > { %1585 = dma.vmem_to_hbm [thread:$0]  (%p2095_p3), %s2247_s20, 256, %s2249_s25, %s1341_s23, %s1942_s14, %s1942_s14, %s1943_s24  }
 0x416 PF: > { %s1387_s28 = sand.u32 1, %s1920_s15   ;;  %p2327_p8 = scmp.ge.s32.totalorder %s1932_s18, 2 }
 0x417   : > { %s1388_s22 = scalar_lea.sflag [#allocation5], %s1387_s28 }
 0x418   : > { %p1606_p11 = pnand %p2327_p8, %p2037_p6 }
 0x41a   : > { %p1607_p2 = pneg %p1606_p11 }
 0x41c   : > { %1911 = dma.done.wait (%p1607_p2), %s1388_s22, 256  }
 0x41d   : > { %1913 = vsyncadd (%p1607_p2), %s1388_s22, 4294967040  ;;  %s1398_s4 = scalar_lea.sflag [#allocation14], %s1387_s28 }
 0x41e   : > { %1915 = dma.done.wait (%p1607_p2), %s1398_s4, 256  }
 0x41f   : > { %1917 = vsyncadd (%p1607_p2), %s1398_s4, 4294967040  ;;  %s2328_s30 = sld [smem:[#allocation20_spill]]  ;;  %p30_p3 = scmp.ge.s32.totalorder %s2085_s26, 4  }
 0x420   : > { %s2329_s15 = smov %s1924_s16  ;;  %s2330_s16 = smov %s1928_s17 }
 0x421   : > { %s2332_s18 = smov %s2085_s26  ;;  %32 = sbr.rel (!%p30_p3) target bundleno = 15 (0xf), region = 137 }
 0x425   : > { %s2331_s17 = smov %s2328_s30 }
 0x426   :  { %1404 = vsyncpa [#allocation4], 1 }
 0x427   :  { %1406 = vsyncpa [#allocation4 + $0x1], 1 }
 0x428   :  { %1407 = vsyncpa [#allocation7], 1 }
 0x429   :  { %1408 = vsyncpa [#allocation10], 1 }
 0x42a   :  { %1409 = vsyncpa [#allocation5], 1 }
 0x42b   :  { %1411 = vsyncpa [#allocation5 + $0x1], 1 }
 0x42c   :  { %1412 = vsyncpa [#allocation14], 1 }
 0x42d   :  { %1414 = vsyncpa [#allocation14 + $0x1], 1 }

</bundles_post_ra>
